<compile_context>
chip_gen: v5e
topology: v5e:2x2
jax: 0.10.0
libtpu: 0.0.40
codegen_flags: <defaults>
</compile_context>

<pallas_src>
import functools
import math

import jax
import jax.numpy as jnp
from jax import lax
from jax.experimental import pallas as pl
from jax.experimental.pallas import tpu as pltpu


# ----------------------------------------------------------------------------
# Fused Pallas kernel: both LSTM passes in one invocation.
# Gate columns are pre-permuted (wrapper-side) from PyTorch's [i, f, g, o]
# to [i, f, o | g] so the sigmoid gates are a single contiguous lane slice.
# ----------------------------------------------------------------------------
def _bflstm_kernel(x_ref, wih_ref, whh_ref, b_ref, wfc_ref, bfc_ref,
                   y1_ref, y2_ref, *, T, B):
    H = whh_ref.shape[0]

    # Hoist all weights / biases once (outside both time loops).
    w_ih = wih_ref[...]          # (P, 4H)   rows beyond D are zero
    w_hh = whh_ref[...]          # (H, 4H)
    b = b_ref[...]               # (1, 4H)   b_ih + b_hh, gate-permuted
    w_fc = wfc_ref[...]          # (H, P)    cols beyond X are zero
    b_fc = bfc_ref[...]          # (1, P)    cols beyond X are zero

    # TODO(synk): if bundle inspection shows Mosaic re-pushing w_hh every step,
    # hold it stationary with pltpu.matmul_push_rhs / matmul_acc_lhs / matmul_pop.
    # TODO(synk): optional bf16 cast of h/w_hh/w_ih (f32 accumulation) to shorten
    # the serial per-step MXU latency; kept f32 here for exact reference parity.

    def lstm_pass(x_2d, h, c, y_out_ref):
        # Whole-sequence input projection: one tall lane-dense MXU op,
        # bias added once (outside the recurrence).
        xg = jnp.dot(x_2d, w_ih, preferred_element_type=jnp.float32) + b  # (T*B, 4H)

        hs = []
        # T is small & static -> trace-time unrolled recurrence, h/c in vregs.
        # TODO(synk): for large T switch to lax.fori_loop(..., unroll=2..4) with a
        # lane-dense (T*B, H) VMEM slab (and a time-chunked grid + vmem_limit_bytes
        # for v7x's smaller VMEM) instead of the register stack below.
        for t in range(T):
            gates = xg[t * B:(t + 1) * B] + jnp.dot(
                h, w_hh, preferred_element_type=jnp.float32)              # (B, 4H)
            # [i, f, o] are contiguous -> one sigmoid over 3H lanes; g is tanh.
            sg = jax.nn.sigmoid(gates[:, :3 * H])
            i = sg[:, 0 * H:1 * H]
            f = sg[:, 1 * H:2 * H]
            o = sg[:, 2 * H:3 * H]
            g = jnp.tanh(gates[:, 3 * H:4 * H])
            c = f * c + i * g
            h = o * jnp.tanh(c)
            hs.append(h)                         # stays in vregs

        # Register-stacked hidden states (T*B, H): no VMEM slab round trip.
        hmat = jnp.concatenate(hs, axis=0)
        # Deferred FC head: one (T*B,H)@(H,P) lane-dense matmul + one unmasked,
        # full-lane output store (fire-and-forget HBM writeback).
        y = jnp.dot(hmat, w_fc, preferred_element_type=jnp.float32) + b_fc  # (T*B, P)
        y_out_ref[...] = y
        return y, h, c

    zeros = jnp.zeros((B, H), jnp.float32)
    # Pass 1: filtering LSTM from zero hidden state.
    y1, h1, c1 = lstm_pass(x_ref[...], zeros, zeros, y1_ref)
    # Pass 2: BFLSTM.forward re-runs the *filtering* model on the filtering
    # outputs, seeded with its final (h, c). y1 is consumed as a value (vregs),
    # not read back from y1_ref; padded y1 columns are exactly zero and padded
    # w_ih rows are zero, so the padded feed-back is exact.
    lstm_pass(y1, h1, c1, y2_ref)


# ----------------------------------------------------------------------------
# JAX wrapper: layout plumbing (transpose, gate permutation, lane padding) and
# a single pallas_call.
# ----------------------------------------------------------------------------
def bflstm_forward(measurements, params):
    """measurements: (B, T, z_dim). Returns (filtering_out, prediction_out),
    each (B, T, x_dim), matching BFLSTM.forward."""
    w_ih, w_hh, b, w_fc, b_fc = (params["w_ih"], params["w_hh"], params["b"],
                                 params["w_fc"], params["b_fc"])
    B, T, D = measurements.shape
    H = w_hh.shape[0]
    X = w_fc.shape[1]
    # BFLSTM.forward feeds filtering outputs back into filtering_model,
    # which requires x_dim == z_dim.
    assert X == D, "BFLSTM.forward requires x_dim == z_dim"

    f32 = jnp.float32
    # Lane-dense padded feature width (multiple of 128).
    P = -(-X // 128) * 128

    # Gate-column permutation [i, f, g, o] -> [i, f, o | g].
    perm = jnp.concatenate([jnp.arange(2 * H), jnp.arange(3 * H, 4 * H),
                            jnp.arange(2 * H, 3 * H)])
    w_ih_p = jnp.zeros((P, 4 * H), f32).at[:D, :].set(w_ih.astype(f32)[:, perm])
    w_hh_p = w_hh.astype(f32)[:, perm]
    b_p = b.astype(f32)[:, perm]
    w_fc_p = jnp.zeros((H, P), f32).at[:, :X].set(w_fc.astype(f32))
    b_fc_p = jnp.zeros((1, P), f32).at[:, :X].set(b_fc.astype(f32))

    # (B, T, D) -> time-major (T*B, D) -> zero-pad lanes to (T*B, P).
    x_flat = jnp.transpose(measurements, (1, 0, 2)).reshape(T * B, D).astype(f32)
    x_pad = jnp.zeros((T * B, P), f32).at[:, :D].set(x_flat)

    vmem = pl.BlockSpec(memory_space=pltpu.MemorySpace.VMEM)
    y1, y2 = pl.pallas_call(
        functools.partial(_bflstm_kernel, T=T, B=B),
        out_shape=(jax.ShapeDtypeStruct((T * B, P), f32),
                   jax.ShapeDtypeStruct((T * B, P), f32)),
        in_specs=[vmem] * 6,
        out_specs=(vmem, vmem),
    )(x_pad, w_ih_p, w_hh_p, b_p, w_fc_p, b_fc_p)
    # TODO(synk): for batched / multi-sequence workloads add a leading "parallel"
    # batch grid axis so v7x's second TensorCore is used.

    def unpack(y):  # (T*B, P) -> (B, T, X)
        return jnp.transpose(y[:, :X].reshape(T, B, X), (1, 0, 2))

    return unpack(y1), unpack(y2)


# ----------------------------------------------------------------------------
# Deterministic parameter init (matches PyTorch LSTM/Linear shapes & init range).
# ----------------------------------------------------------------------------
def init_vanilla_lstm_params(key, input_dim, hidden_dim, target_dim):
    stdv = 1.0 / math.sqrt(hidden_dim)
    ks = jax.random.split(key, 6)
    u = lambda k, shp: jax.random.uniform(k, shp, jnp.float32, -stdv, stdv)
    return {
        # PyTorch stores weight_ih as (4H, D); kernel uses the transpose (D, 4H).
        "w_ih": u(ks[0], (input_dim, 4 * hidden_dim)),
        "w_hh": u(ks[1], (hidden_dim, 4 * hidden_dim)),
        "b":    u(ks[2], (1, 4 * hidden_dim)) + u(ks[3], (1, 4 * hidden_dim)),
        "w_fc": u(ks[4], (hidden_dim, target_dim)),
        "b_fc": u(ks[5], (1, target_dim)),
    }


# ----------------------------------------------------------------------------
# Plain-JAX reference (lax.scan, PyTorch gate order) for the correctness check.
# ----------------------------------------------------------------------------
def vanilla_lstm_ref(x_btd, params, hidden=None):
    w_ih, w_hh, b, w_fc, b_fc = (params["w_ih"], params["w_hh"], params["b"],
                                 params["w_fc"], params["b_fc"])
    B = x_btd.shape[0]
    H = w_hh.shape[0]
    if hidden is None:
        hidden = (jnp.zeros((B, H), jnp.float32), jnp.zeros((B, H), jnp.float32))

    def step(carry, x_t):
        h, c = carry
        gates = x_t @ w_ih + h @ w_hh + b
        i = jax.nn.sigmoid(gates[:, 0 * H:1 * H])
        f = jax.nn.sigmoid(gates[:, 1 * H:2 * H])
        g = jnp.tanh(gates[:, 2 * H:3 * H])
        o = jax.nn.sigmoid(gates[:, 3 * H:4 * H])
        c_new = f * c + i * g
        h_new = o * jnp.tanh(c_new)
        return (h_new, c_new), h_new @ w_fc + b_fc

    (h_n, c_n), y = lax.scan(step, hidden, jnp.transpose(x_btd, (1, 0, 2)))
    return jnp.transpose(y, (1, 0, 2)), (h_n, c_n)


def bflstm_ref(measurements, filtering_params):
    filt, hc = vanilla_lstm_ref(measurements, filtering_params)
    pred, _ = vanilla_lstm_ref(filt, filtering_params, hc)
    return filt, pred


if __name__ == "__main__":
    # Small shapes consistent with the module (z_dim == x_dim required by the
    # original forward; hidden_dim=32 from default filtering_params).
    B, T = 2, 8
    z_dim = x_dim = 8
    hidden_dim = 32

    key = jax.random.PRNGKey(0)
    k_param, k_x = jax.random.split(key)
    filtering_params = init_vanilla_lstm_params(k_param, z_dim, hidden_dim, x_dim)
    # TODO(synk): prediction_model params are created by BFLSTM.__init__ but
    # never used by forward (it calls filtering_model twice), so not built here.

    measurements = jax.random.normal(k_x, (B, T, z_dim), jnp.float32)

    fwd = jax.jit(functools.partial(bflstm_forward, params=filtering_params))
    filt_out, pred_out = fwd(measurements)
    jax.block_until_ready((filt_out, pred_out))

    filt_ref, pred_ref = bflstm_ref(measurements, filtering_params)
    assert filt_out.shape == (B, T, x_dim) and pred_out.shape == (B, T, x_dim)
    assert jnp.allclose(filt_out, filt_ref, atol=1e-5, rtol=1e-5)
    assert jnp.allclose(pred_out, pred_ref, atol=1e-5, rtol=1e-5)

    print("KERNEL_OK")
</pallas_src>

<mosaic_0001>
module attributes {stable_mosaic.version = 11 : i64} {
  func.func @_bflstm_kernel(%arg0: memref<16x128xf32, #tpu.memory_space<vmem>>, %arg1: memref<128x128xf32, #tpu.memory_space<vmem>>, %arg2: memref<32x128xf32, #tpu.memory_space<vmem>>, %arg3: memref<1x128xf32, #tpu.memory_space<vmem>>, %arg4: memref<32x128xf32, #tpu.memory_space<vmem>>, %arg5: memref<1x128xf32, #tpu.memory_space<vmem>>, %arg6: memref<16x128xf32, #tpu.memory_space<vmem>>, %arg7: memref<16x128xf32, #tpu.memory_space<vmem>>) attributes {dimension_semantics = [], scalar_prefetch = 0 : i64, scratch_operands = 0 : i64, tpu.core_type = #tpu.core_type<tc>} {
    %c0 = arith.constant 0 : index
    %c0_0 = arith.constant 0 : index
    %0 = vector.load %arg1[%c0, %c0_0] : memref<128x128xf32, #tpu.memory_space<vmem>>, vector<128x128xf32>
    %c0_1 = arith.constant 0 : index
    %c0_2 = arith.constant 0 : index
    %1 = vector.load %arg2[%c0_1, %c0_2] : memref<32x128xf32, #tpu.memory_space<vmem>>, vector<32x128xf32>
    %c0_3 = arith.constant 0 : index
    %c0_4 = arith.constant 0 : index
    %2 = vector.load %arg3[%c0_3, %c0_4] : memref<1x128xf32, #tpu.memory_space<vmem>>, vector<1x128xf32>
    %c0_5 = arith.constant 0 : index
    %c0_6 = arith.constant 0 : index
    %3 = vector.load %arg4[%c0_5, %c0_6] : memref<32x128xf32, #tpu.memory_space<vmem>>, vector<32x128xf32>
    %c0_7 = arith.constant 0 : index
    %c0_8 = arith.constant 0 : index
    %4 = vector.load %arg5[%c0_7, %c0_8] : memref<1x128xf32, #tpu.memory_space<vmem>>, vector<1x128xf32>
    %cst = arith.constant 0.000000e+00 : f32
    %5 = vector.broadcast %cst : f32 to vector<2x32xf32>
    %c0_9 = arith.constant 0 : index
    %c0_10 = arith.constant 0 : index
    %6 = vector.load %arg0[%c0_9, %c0_10] : memref<16x128xf32, #tpu.memory_space<vmem>>, vector<16x128xf32>
    %cst_11 = arith.constant dense<0.000000e+00> : vector<16x128xf32>
    %7 = tpu.matmul %6, %0, %cst_11 {dimension_numbers = #tpu.dot_dimension_numbers<[1], [0], [0], [1], [0, 0, 1, 1], [], []>} : vector<16x128xf32>, vector<128x128xf32>, vector<16x128xf32> -> vector<16x128xf32>
    %8 = vector.broadcast %2 : vector<1x128xf32> to vector<16x128xf32>
    %9 = arith.addf %7, %8 : vector<16x128xf32>
    %10 = vector.extract_strided_slice %9 {offsets = [0, 0], sizes = [2, 128], strides = [1, 1]} : vector<16x128xf32> to vector<2x128xf32>
    %cst_12 = arith.constant dense<0.000000e+00> : vector<2x128xf32>
    %11 = tpu.matmul %5, %1, %cst_12 {dimension_numbers = #tpu.dot_dimension_numbers<[1], [0], [0], [1], [0, 0, 1, 1], [], []>} : vector<2x32xf32>, vector<32x128xf32>, vector<2x128xf32> -> vector<2x128xf32>
    %12 = arith.addf %10, %11 : vector<2x128xf32>
    %13 = vector.extract_strided_slice %12 {offsets = [0, 0], sizes = [2, 96], strides = [1, 1]} : vector<2x128xf32> to vector<2x96xf32>
    %14 = arith.negf %13 : vector<2x96xf32>
    %15 = math.exp %14 : vector<2x96xf32>
    %cst_13 = arith.constant 1.000000e+00 : f32
    %16 = vector.broadcast %cst_13 : f32 to vector<2x96xf32>
    %17 = arith.addf %16, %15 : vector<2x96xf32>
    %18 = arith.divf %16, %17 : vector<2x96xf32>
    %19 = vector.extract_strided_slice %18 {offsets = [0, 0], sizes = [2, 32], strides = [1, 1]} : vector<2x96xf32> to vector<2x32xf32>
    %20 = vector.extract_strided_slice %18 {offsets = [0, 32], sizes = [2, 32], strides = [1, 1]} : vector<2x96xf32> to vector<2x32xf32>
    %21 = vector.extract_strided_slice %18 {offsets = [0, 64], sizes = [2, 32], strides = [1, 1]} : vector<2x96xf32> to vector<2x32xf32>
    %22 = vector.extract_strided_slice %12 {offsets = [0, 96], sizes = [2, 32], strides = [1, 1]} : vector<2x128xf32> to vector<2x32xf32>
    %23 = math.tanh %22 : vector<2x32xf32>
    %24 = arith.mulf %20, %5 : vector<2x32xf32>
    %25 = arith.mulf %19, %23 : vector<2x32xf32>
    %26 = arith.addf %24, %25 : vector<2x32xf32>
    %27 = math.tanh %26 : vector<2x32xf32>
    %28 = arith.mulf %21, %27 : vector<2x32xf32>
    %29 = vector.extract_strided_slice %9 {offsets = [2, 0], sizes = [2, 128], strides = [1, 1]} : vector<16x128xf32> to vector<2x128xf32>
    %cst_14 = arith.constant dense<0.000000e+00> : vector<2x128xf32>
    %30 = tpu.matmul %28, %1, %cst_14 {dimension_numbers = #tpu.dot_dimension_numbers<[1], [0], [0], [1], [0, 0, 1, 1], [], []>} : vector<2x32xf32>, vector<32x128xf32>, vector<2x128xf32> -> vector<2x128xf32>
    %31 = arith.addf %29, %30 : vector<2x128xf32>
    %32 = vector.extract_strided_slice %31 {offsets = [0, 0], sizes = [2, 96], strides = [1, 1]} : vector<2x128xf32> to vector<2x96xf32>
    %33 = arith.negf %32 : vector<2x96xf32>
    %34 = math.exp %33 : vector<2x96xf32>
    %cst_15 = arith.constant 1.000000e+00 : f32
    %35 = vector.broadcast %cst_15 : f32 to vector<2x96xf32>
    %36 = arith.addf %35, %34 : vector<2x96xf32>
    %37 = arith.divf %35, %36 : vector<2x96xf32>
    %38 = vector.extract_strided_slice %37 {offsets = [0, 0], sizes = [2, 32], strides = [1, 1]} : vector<2x96xf32> to vector<2x32xf32>
    %39 = vector.extract_strided_slice %37 {offsets = [0, 32], sizes = [2, 32], strides = [1, 1]} : vector<2x96xf32> to vector<2x32xf32>
    %40 = vector.extract_strided_slice %37 {offsets = [0, 64], sizes = [2, 32], strides = [1, 1]} : vector<2x96xf32> to vector<2x32xf32>
    %41 = vector.extract_strided_slice %31 {offsets = [0, 96], sizes = [2, 32], strides = [1, 1]} : vector<2x128xf32> to vector<2x32xf32>
    %42 = math.tanh %41 : vector<2x32xf32>
    %43 = arith.mulf %39, %26 : vector<2x32xf32>
    %44 = arith.mulf %38, %42 : vector<2x32xf32>
    %45 = arith.addf %43, %44 : vector<2x32xf32>
    %46 = math.tanh %45 : vector<2x32xf32>
    %47 = arith.mulf %40, %46 : vector<2x32xf32>
    %48 = vector.extract_strided_slice %9 {offsets = [4, 0], sizes = [2, 128], strides = [1, 1]} : vector<16x128xf32> to vector<2x128xf32>
    %cst_16 = arith.constant dense<0.000000e+00> : vector<2x128xf32>
    %49 = tpu.matmul %47, %1, %cst_16 {dimension_numbers = #tpu.dot_dimension_numbers<[1], [0], [0], [1], [0, 0, 1, 1], [], []>} : vector<2x32xf32>, vector<32x128xf32>, vector<2x128xf32> -> vector<2x128xf32>
    %50 = arith.addf %48, %49 : vector<2x128xf32>
    %51 = vector.extract_strided_slice %50 {offsets = [0, 0], sizes = [2, 96], strides = [1, 1]} : vector<2x128xf32> to vector<2x96xf32>
    %52 = arith.negf %51 : vector<2x96xf32>
    %53 = math.exp %52 : vector<2x96xf32>
    %cst_17 = arith.constant 1.000000e+00 : f32
    %54 = vector.broadcast %cst_17 : f32 to vector<2x96xf32>
    %55 = arith.addf %54, %53 : vector<2x96xf32>
    %56 = arith.divf %54, %55 : vector<2x96xf32>
    %57 = vector.extract_strided_slice %56 {offsets = [0, 0], sizes = [2, 32], strides = [1, 1]} : vector<2x96xf32> to vector<2x32xf32>
    %58 = vector.extract_strided_slice %56 {offsets = [0, 32], sizes = [2, 32], strides = [1, 1]} : vector<2x96xf32> to vector<2x32xf32>
    %59 = vector.extract_strided_slice %56 {offsets = [0, 64], sizes = [2, 32], strides = [1, 1]} : vector<2x96xf32> to vector<2x32xf32>
    %60 = vector.extract_strided_slice %50 {offsets = [0, 96], sizes = [2, 32], strides = [1, 1]} : vector<2x128xf32> to vector<2x32xf32>
    %61 = math.tanh %60 : vector<2x32xf32>
    %62 = arith.mulf %58, %45 : vector<2x32xf32>
    %63 = arith.mulf %57, %61 : vector<2x32xf32>
    %64 = arith.addf %62, %63 : vector<2x32xf32>
    %65 = math.tanh %64 : vector<2x32xf32>
    %66 = arith.mulf %59, %65 : vector<2x32xf32>
    %67 = vector.extract_strided_slice %9 {offsets = [6, 0], sizes = [2, 128], strides = [1, 1]} : vector<16x128xf32> to vector<2x128xf32>
    %cst_18 = arith.constant dense<0.000000e+00> : vector<2x128xf32>
    %68 = tpu.matmul %66, %1, %cst_18 {dimension_numbers = #tpu.dot_dimension_numbers<[1], [0], [0], [1], [0, 0, 1, 1], [], []>} : vector<2x32xf32>, vector<32x128xf32>, vector<2x128xf32> -> vector<2x128xf32>
    %69 = arith.addf %67, %68 : vector<2x128xf32>
    %70 = vector.extract_strided_slice %69 {offsets = [0, 0], sizes = [2, 96], strides = [1, 1]} : vector<2x128xf32> to vector<2x96xf32>
    %71 = arith.negf %70 : vector<2x96xf32>
    %72 = math.exp %71 : vector<2x96xf32>
    %cst_19 = arith.constant 1.000000e+00 : f32
    %73 = vector.broadcast %cst_19 : f32 to vector<2x96xf32>
    %74 = arith.addf %73, %72 : vector<2x96xf32>
    %75 = arith.divf %73, %74 : vector<2x96xf32>
    %76 = vector.extract_strided_slice %75 {offsets = [0, 0], sizes = [2, 32], strides = [1, 1]} : vector<2x96xf32> to vector<2x32xf32>
    %77 = vector.extract_strided_slice %75 {offsets = [0, 32], sizes = [2, 32], strides = [1, 1]} : vector<2x96xf32> to vector<2x32xf32>
    %78 = vector.extract_strided_slice %75 {offsets = [0, 64], sizes = [2, 32], strides = [1, 1]} : vector<2x96xf32> to vector<2x32xf32>
    %79 = vector.extract_strided_slice %69 {offsets = [0, 96], sizes = [2, 32], strides = [1, 1]} : vector<2x128xf32> to vector<2x32xf32>
    %80 = math.tanh %79 : vector<2x32xf32>
    %81 = arith.mulf %77, %64 : vector<2x32xf32>
    %82 = arith.mulf %76, %80 : vector<2x32xf32>
    %83 = arith.addf %81, %82 : vector<2x32xf32>
    %84 = math.tanh %83 : vector<2x32xf32>
    %85 = arith.mulf %78, %84 : vector<2x32xf32>
    %86 = vector.extract_strided_slice %9 {offsets = [8, 0], sizes = [2, 128], strides = [1, 1]} : vector<16x128xf32> to vector<2x128xf32>
    %cst_20 = arith.constant dense<0.000000e+00> : vector<2x128xf32>
    %87 = tpu.matmul %85, %1, %cst_20 {dimension_numbers = #tpu.dot_dimension_numbers<[1], [0], [0], [1], [0, 0, 1, 1], [], []>} : vector<2x32xf32>, vector<32x128xf32>, vector<2x128xf32> -> vector<2x128xf32>
    %88 = arith.addf %86, %87 : vector<2x128xf32>
    %89 = vector.extract_strided_slice %88 {offsets = [0, 0], sizes = [2, 96], strides = [1, 1]} : vector<2x128xf32> to vector<2x96xf32>
    %90 = arith.negf %89 : vector<2x96xf32>
    %91 = math.exp %90 : vector<2x96xf32>
    %cst_21 = arith.constant 1.000000e+00 : f32
    %92 = vector.broadcast %cst_21 : f32 to vector<2x96xf32>
    %93 = arith.addf %92, %91 : vector<2x96xf32>
    %94 = arith.divf %92, %93 : vector<2x96xf32>
    %95 = vector.extract_strided_slice %94 {offsets = [0, 0], sizes = [2, 32], strides = [1, 1]} : vector<2x96xf32> to vector<2x32xf32>
    %96 = vector.extract_strided_slice %94 {offsets = [0, 32], sizes = [2, 32], strides = [1, 1]} : vector<2x96xf32> to vector<2x32xf32>
    %97 = vector.extract_strided_slice %94 {offsets = [0, 64], sizes = [2, 32], strides = [1, 1]} : vector<2x96xf32> to vector<2x32xf32>
    %98 = vector.extract_strided_slice %88 {offsets = [0, 96], sizes = [2, 32], strides = [1, 1]} : vector<2x128xf32> to vector<2x32xf32>
    %99 = math.tanh %98 : vector<2x32xf32>
    %100 = arith.mulf %96, %83 : vector<2x32xf32>
    %101 = arith.mulf %95, %99 : vector<2x32xf32>
    %102 = arith.addf %100, %101 : vector<2x32xf32>
    %103 = math.tanh %102 : vector<2x32xf32>
    %104 = arith.mulf %97, %103 : vector<2x32xf32>
    %105 = vector.extract_strided_slice %9 {offsets = [10, 0], sizes = [2, 128], strides = [1, 1]} : vector<16x128xf32> to vector<2x128xf32>
    %cst_22 = arith.constant dense<0.000000e+00> : vector<2x128xf32>
    %106 = tpu.matmul %104, %1, %cst_22 {dimension_numbers = #tpu.dot_dimension_numbers<[1], [0], [0], [1], [0, 0, 1, 1], [], []>} : vector<2x32xf32>, vector<32x128xf32>, vector<2x128xf32> -> vector<2x128xf32>
    %107 = arith.addf %105, %106 : vector<2x128xf32>
    %108 = vector.extract_strided_slice %107 {offsets = [0, 0], sizes = [2, 96], strides = [1, 1]} : vector<2x128xf32> to vector<2x96xf32>
    %109 = arith.negf %108 : vector<2x96xf32>
    %110 = math.exp %109 : vector<2x96xf32>
    %cst_23 = arith.constant 1.000000e+00 : f32
    %111 = vector.broadcast %cst_23 : f32 to vector<2x96xf32>
    %112 = arith.addf %111, %110 : vector<2x96xf32>
    %113 = arith.divf %111, %112 : vector<2x96xf32>
    %114 = vector.extract_strided_slice %113 {offsets = [0, 0], sizes = [2, 32], strides = [1, 1]} : vector<2x96xf32> to vector<2x32xf32>
    %115 = vector.extract_strided_slice %113 {offsets = [0, 32], sizes = [2, 32], strides = [1, 1]} : vector<2x96xf32> to vector<2x32xf32>
    %116 = vector.extract_strided_slice %113 {offsets = [0, 64], sizes = [2, 32], strides = [1, 1]} : vector<2x96xf32> to vector<2x32xf32>
    %117 = vector.extract_strided_slice %107 {offsets = [0, 96], sizes = [2, 32], strides = [1, 1]} : vector<2x128xf32> to vector<2x32xf32>
    %118 = math.tanh %117 : vector<2x32xf32>
    %119 = arith.mulf %115, %102 : vector<2x32xf32>
    %120 = arith.mulf %114, %118 : vector<2x32xf32>
    %121 = arith.addf %119, %120 : vector<2x32xf32>
    %122 = math.tanh %121 : vector<2x32xf32>
    %123 = arith.mulf %116, %122 : vector<2x32xf32>
    %124 = vector.extract_strided_slice %9 {offsets = [12, 0], sizes = [2, 128], strides = [1, 1]} : vector<16x128xf32> to vector<2x128xf32>
    %cst_24 = arith.constant dense<0.000000e+00> : vector<2x128xf32>
    %125 = tpu.matmul %123, %1, %cst_24 {dimension_numbers = #tpu.dot_dimension_numbers<[1], [0], [0], [1], [0, 0, 1, 1], [], []>} : vector<2x32xf32>, vector<32x128xf32>, vector<2x128xf32> -> vector<2x128xf32>
    %126 = arith.addf %124, %125 : vector<2x128xf32>
    %127 = vector.extract_strided_slice %126 {offsets = [0, 0], sizes = [2, 96], strides = [1, 1]} : vector<2x128xf32> to vector<2x96xf32>
    %128 = arith.negf %127 : vector<2x96xf32>
    %129 = math.exp %128 : vector<2x96xf32>
    %cst_25 = arith.constant 1.000000e+00 : f32
    %130 = vector.broadcast %cst_25 : f32 to vector<2x96xf32>
    %131 = arith.addf %130, %129 : vector<2x96xf32>
    %132 = arith.divf %130, %131 : vector<2x96xf32>
    %133 = vector.extract_strided_slice %132 {offsets = [0, 0], sizes = [2, 32], strides = [1, 1]} : vector<2x96xf32> to vector<2x32xf32>
    %134 = vector.extract_strided_slice %132 {offsets = [0, 32], sizes = [2, 32], strides = [1, 1]} : vector<2x96xf32> to vector<2x32xf32>
    %135 = vector.extract_strided_slice %132 {offsets = [0, 64], sizes = [2, 32], strides = [1, 1]} : vector<2x96xf32> to vector<2x32xf32>
    %136 = vector.extract_strided_slice %126 {offsets = [0, 96], sizes = [2, 32], strides = [1, 1]} : vector<2x128xf32> to vector<2x32xf32>
    %137 = math.tanh %136 : vector<2x32xf32>
    %138 = arith.mulf %134, %121 : vector<2x32xf32>
    %139 = arith.mulf %133, %137 : vector<2x32xf32>
    %140 = arith.addf %138, %139 : vector<2x32xf32>
    %141 = math.tanh %140 : vector<2x32xf32>
    %142 = arith.mulf %135, %141 : vector<2x32xf32>
    %143 = vector.extract_strided_slice %9 {offsets = [14, 0], sizes = [2, 128], strides = [1, 1]} : vector<16x128xf32> to vector<2x128xf32>
    %cst_26 = arith.constant dense<0.000000e+00> : vector<2x128xf32>
    %144 = tpu.matmul %142, %1, %cst_26 {dimension_numbers = #tpu.dot_dimension_numbers<[1], [0], [0], [1], [0, 0, 1, 1], [], []>} : vector<2x32xf32>, vector<32x128xf32>, vector<2x128xf32> -> vector<2x128xf32>
    %145 = arith.addf %143, %144 : vector<2x128xf32>
    %146 = vector.extract_strided_slice %145 {offsets = [0, 0], sizes = [2, 96], strides = [1, 1]} : vector<2x128xf32> to vector<2x96xf32>
    %147 = arith.negf %146 : vector<2x96xf32>
    %148 = math.exp %147 : vector<2x96xf32>
    %cst_27 = arith.constant 1.000000e+00 : f32
    %149 = vector.broadcast %cst_27 : f32 to vector<2x96xf32>
    %150 = arith.addf %149, %148 : vector<2x96xf32>
    %151 = arith.divf %149, %150 : vector<2x96xf32>
    %152 = vector.extract_strided_slice %151 {offsets = [0, 0], sizes = [2, 32], strides = [1, 1]} : vector<2x96xf32> to vector<2x32xf32>
    %153 = vector.extract_strided_slice %151 {offsets = [0, 32], sizes = [2, 32], strides = [1, 1]} : vector<2x96xf32> to vector<2x32xf32>
    %154 = vector.extract_strided_slice %151 {offsets = [0, 64], sizes = [2, 32], strides = [1, 1]} : vector<2x96xf32> to vector<2x32xf32>
    %155 = vector.extract_strided_slice %145 {offsets = [0, 96], sizes = [2, 32], strides = [1, 1]} : vector<2x128xf32> to vector<2x32xf32>
    %156 = math.tanh %155 : vector<2x32xf32>
    %157 = arith.mulf %153, %140 : vector<2x32xf32>
    %158 = arith.mulf %152, %156 : vector<2x32xf32>
    %159 = arith.addf %157, %158 : vector<2x32xf32>
    %160 = math.tanh %159 : vector<2x32xf32>
    %161 = arith.mulf %154, %160 : vector<2x32xf32>
    %162 = tpu.concatenate %28, %47, %66, %85, %104, %123, %142, %161 in 0 : vector<2x32xf32>, vector<2x32xf32>, vector<2x32xf32>, vector<2x32xf32>, vector<2x32xf32>, vector<2x32xf32>, vector<2x32xf32>, vector<2x32xf32> -> vector<16x32xf32>
    %cst_28 = arith.constant dense<0.000000e+00> : vector<16x128xf32>
    %163 = tpu.matmul %162, %3, %cst_28 {dimension_numbers = #tpu.dot_dimension_numbers<[1], [0], [0], [1], [0, 0, 1, 1], [], []>} : vector<16x32xf32>, vector<32x128xf32>, vector<16x128xf32> -> vector<16x128xf32>
    %164 = vector.broadcast %4 : vector<1x128xf32> to vector<16x128xf32>
    %165 = arith.addf %163, %164 : vector<16x128xf32>
    %c0_29 = arith.constant 0 : index
    %c0_30 = arith.constant 0 : index
    %166 = vector.load %arg6[%c0_29, %c0_30] : memref<16x128xf32, #tpu.memory_space<vmem>>, vector<16x128xf32>
    tpu.vector_store %arg6[%c0_29, %c0_30], %165 {strides = array<i32>} : memref<16x128xf32, #tpu.memory_space<vmem>>, vector<16x128xf32>,
    %cst_31 = arith.constant dense<0.000000e+00> : vector<16x128xf32>
    %167 = tpu.matmul %165, %0, %cst_31 {dimension_numbers = #tpu.dot_dimension_numbers<[1], [0], [0], [1], [0, 0, 1, 1], [], []>} : vector<16x128xf32>, vector<128x128xf32>, vector<16x128xf32> -> vector<16x128xf32>
    %168 = vector.broadcast %2 : vector<1x128xf32> to vector<16x128xf32>
    %169 = arith.addf %167, %168 : vector<16x128xf32>
    %170 = vector.extract_strided_slice %169 {offsets = [0, 0], sizes = [2, 128], strides = [1, 1]} : vector<16x128xf32> to vector<2x128xf32>
    %cst_32 = arith.constant dense<0.000000e+00> : vector<2x128xf32>
    %171 = tpu.matmul %161, %1, %cst_32 {dimension_numbers = #tpu.dot_dimension_numbers<[1], [0], [0], [1], [0, 0, 1, 1], [], []>} : vector<2x32xf32>, vector<32x128xf32>, vector<2x128xf32> -> vector<2x128xf32>
    %172 = arith.addf %170, %171 : vector<2x128xf32>
    %173 = vector.extract_strided_slice %172 {offsets = [0, 0], sizes = [2, 96], strides = [1, 1]} : vector<2x128xf32> to vector<2x96xf32>
    %174 = arith.negf %173 : vector<2x96xf32>
    %175 = math.exp %174 : vector<2x96xf32>
    %cst_33 = arith.constant 1.000000e+00 : f32
    %176 = vector.broadcast %cst_33 : f32 to vector<2x96xf32>
    %177 = arith.addf %176, %175 : vector<2x96xf32>
    %178 = arith.divf %176, %177 : vector<2x96xf32>
    %179 = vector.extract_strided_slice %178 {offsets = [0, 0], sizes = [2, 32], strides = [1, 1]} : vector<2x96xf32> to vector<2x32xf32>
    %180 = vector.extract_strided_slice %178 {offsets = [0, 32], sizes = [2, 32], strides = [1, 1]} : vector<2x96xf32> to vector<2x32xf32>
    %181 = vector.extract_strided_slice %178 {offsets = [0, 64], sizes = [2, 32], strides = [1, 1]} : vector<2x96xf32> to vector<2x32xf32>
    %182 = vector.extract_strided_slice %172 {offsets = [0, 96], sizes = [2, 32], strides = [1, 1]} : vector<2x128xf32> to vector<2x32xf32>
    %183 = math.tanh %182 : vector<2x32xf32>
    %184 = arith.mulf %180, %159 : vector<2x32xf32>
    %185 = arith.mulf %179, %183 : vector<2x32xf32>
    %186 = arith.addf %184, %185 : vector<2x32xf32>
    %187 = math.tanh %186 : vector<2x32xf32>
    %188 = arith.mulf %181, %187 : vector<2x32xf32>
    %189 = vector.extract_strided_slice %169 {offsets = [2, 0], sizes = [2, 128], strides = [1, 1]} : vector<16x128xf32> to vector<2x128xf32>
    %cst_34 = arith.constant dense<0.000000e+00> : vector<2x128xf32>
    %190 = tpu.matmul %188, %1, %cst_34 {dimension_numbers = #tpu.dot_dimension_numbers<[1], [0], [0], [1], [0, 0, 1, 1], [], []>} : vector<2x32xf32>, vector<32x128xf32>, vector<2x128xf32> -> vector<2x128xf32>
    %191 = arith.addf %189, %190 : vector<2x128xf32>
    %192 = vector.extract_strided_slice %191 {offsets = [0, 0], sizes = [2, 96], strides = [1, 1]} : vector<2x128xf32> to vector<2x96xf32>
    %193 = arith.negf %192 : vector<2x96xf32>
    %194 = math.exp %193 : vector<2x96xf32>
    %cst_35 = arith.constant 1.000000e+00 : f32
    %195 = vector.broadcast %cst_35 : f32 to vector<2x96xf32>
    %196 = arith.addf %195, %194 : vector<2x96xf32>
    %197 = arith.divf %195, %196 : vector<2x96xf32>
    %198 = vector.extract_strided_slice %197 {offsets = [0, 0], sizes = [2, 32], strides = [1, 1]} : vector<2x96xf32> to vector<2x32xf32>
    %199 = vector.extract_strided_slice %197 {offsets = [0, 32], sizes = [2, 32], strides = [1, 1]} : vector<2x96xf32> to vector<2x32xf32>
    %200 = vector.extract_strided_slice %197 {offsets = [0, 64], sizes = [2, 32], strides = [1, 1]} : vector<2x96xf32> to vector<2x32xf32>
    %201 = vector.extract_strided_slice %191 {offsets = [0, 96], sizes = [2, 32], strides = [1, 1]} : vector<2x128xf32> to vector<2x32xf32>
    %202 = math.tanh %201 : vector<2x32xf32>
    %203 = arith.mulf %199, %186 : vector<2x32xf32>
    %204 = arith.mulf %198, %202 : vector<2x32xf32>
    %205 = arith.addf %203, %204 : vector<2x32xf32>
    %206 = math.tanh %205 : vector<2x32xf32>
    %207 = arith.mulf %200, %206 : vector<2x32xf32>
    %208 = vector.extract_strided_slice %169 {offsets = [4, 0], sizes = [2, 128], strides = [1, 1]} : vector<16x128xf32> to vector<2x128xf32>
    %cst_36 = arith.constant dense<0.000000e+00> : vector<2x128xf32>
    %209 = tpu.matmul %207, %1, %cst_36 {dimension_numbers = #tpu.dot_dimension_numbers<[1], [0], [0], [1], [0, 0, 1, 1], [], []>} : vector<2x32xf32>, vector<32x128xf32>, vector<2x128xf32> -> vector<2x128xf32>
    %210 = arith.addf %208, %209 : vector<2x128xf32>
    %211 = vector.extract_strided_slice %210 {offsets = [0, 0], sizes = [2, 96], strides = [1, 1]} : vector<2x128xf32> to vector<2x96xf32>
    %212 = arith.negf %211 : vector<2x96xf32>
    %213 = math.exp %212 : vector<2x96xf32>
    %cst_37 = arith.constant 1.000000e+00 : f32
    %214 = vector.broadcast %cst_37 : f32 to vector<2x96xf32>
    %215 = arith.addf %214, %213 : vector<2x96xf32>
    %216 = arith.divf %214, %215 : vector<2x96xf32>
    %217 = vector.extract_strided_slice %216 {offsets = [0, 0], sizes = [2, 32], strides = [1, 1]} : vector<2x96xf32> to vector<2x32xf32>
    %218 = vector.extract_strided_slice %216 {offsets = [0, 32], sizes = [2, 32], strides = [1, 1]} : vector<2x96xf32> to vector<2x32xf32>
    %219 = vector.extract_strided_slice %216 {offsets = [0, 64], sizes = [2, 32], strides = [1, 1]} : vector<2x96xf32> to vector<2x32xf32>
    %220 = vector.extract_strided_slice %210 {offsets = [0, 96], sizes = [2, 32], strides = [1, 1]} : vector<2x128xf32> to vector<2x32xf32>
    %221 = math.tanh %220 : vector<2x32xf32>
    %222 = arith.mulf %218, %205 : vector<2x32xf32>
    %223 = arith.mulf %217, %221 : vector<2x32xf32>
    %224 = arith.addf %222, %223 : vector<2x32xf32>
    %225 = math.tanh %224 : vector<2x32xf32>
    %226 = arith.mulf %219, %225 : vector<2x32xf32>
    %227 = vector.extract_strided_slice %169 {offsets = [6, 0], sizes = [2, 128], strides = [1, 1]} : vector<16x128xf32> to vector<2x128xf32>
    %cst_38 = arith.constant dense<0.000000e+00> : vector<2x128xf32>
    %228 = tpu.matmul %226, %1, %cst_38 {dimension_numbers = #tpu.dot_dimension_numbers<[1], [0], [0], [1], [0, 0, 1, 1], [], []>} : vector<2x32xf32>, vector<32x128xf32>, vector<2x128xf32> -> vector<2x128xf32>
    %229 = arith.addf %227, %228 : vector<2x128xf32>
    %230 = vector.extract_strided_slice %229 {offsets = [0, 0], sizes = [2, 96], strides = [1, 1]} : vector<2x128xf32> to vector<2x96xf32>
    %231 = arith.negf %230 : vector<2x96xf32>
    %232 = math.exp %231 : vector<2x96xf32>
    %cst_39 = arith.constant 1.000000e+00 : f32
    %233 = vector.broadcast %cst_39 : f32 to vector<2x96xf32>
    %234 = arith.addf %233, %232 : vector<2x96xf32>
    %235 = arith.divf %233, %234 : vector<2x96xf32>
    %236 = vector.extract_strided_slice %235 {offsets = [0, 0], sizes = [2, 32], strides = [1, 1]} : vector<2x96xf32> to vector<2x32xf32>
    %237 = vector.extract_strided_slice %235 {offsets = [0, 32], sizes = [2, 32], strides = [1, 1]} : vector<2x96xf32> to vector<2x32xf32>
    %238 = vector.extract_strided_slice %235 {offsets = [0, 64], sizes = [2, 32], strides = [1, 1]} : vector<2x96xf32> to vector<2x32xf32>
    %239 = vector.extract_strided_slice %229 {offsets = [0, 96], sizes = [2, 32], strides = [1, 1]} : vector<2x128xf32> to vector<2x32xf32>
    %240 = math.tanh %239 : vector<2x32xf32>
    %241 = arith.mulf %237, %224 : vector<2x32xf32>
    %242 = arith.mulf %236, %240 : vector<2x32xf32>
    %243 = arith.addf %241, %242 : vector<2x32xf32>
    %244 = math.tanh %243 : vector<2x32xf32>
    %245 = arith.mulf %238, %244 : vector<2x32xf32>
    %246 = vector.extract_strided_slice %169 {offsets = [8, 0], sizes = [2, 128], strides = [1, 1]} : vector<16x128xf32> to vector<2x128xf32>
    %cst_40 = arith.constant dense<0.000000e+00> : vector<2x128xf32>
    %247 = tpu.matmul %245, %1, %cst_40 {dimension_numbers = #tpu.dot_dimension_numbers<[1], [0], [0], [1], [0, 0, 1, 1], [], []>} : vector<2x32xf32>, vector<32x128xf32>, vector<2x128xf32> -> vector<2x128xf32>
    %248 = arith.addf %246, %247 : vector<2x128xf32>
    %249 = vector.extract_strided_slice %248 {offsets = [0, 0], sizes = [2, 96], strides = [1, 1]} : vector<2x128xf32> to vector<2x96xf32>
    %250 = arith.negf %249 : vector<2x96xf32>
    %251 = math.exp %250 : vector<2x96xf32>
    %cst_41 = arith.constant 1.000000e+00 : f32
    %252 = vector.broadcast %cst_41 : f32 to vector<2x96xf32>
    %253 = arith.addf %252, %251 : vector<2x96xf32>
    %254 = arith.divf %252, %253 : vector<2x96xf32>
    %255 = vector.extract_strided_slice %254 {offsets = [0, 0], sizes = [2, 32], strides = [1, 1]} : vector<2x96xf32> to vector<2x32xf32>
    %256 = vector.extract_strided_slice %254 {offsets = [0, 32], sizes = [2, 32], strides = [1, 1]} : vector<2x96xf32> to vector<2x32xf32>
    %257 = vector.extract_strided_slice %254 {offsets = [0, 64], sizes = [2, 32], strides = [1, 1]} : vector<2x96xf32> to vector<2x32xf32>
    %258 = vector.extract_strided_slice %248 {offsets = [0, 96], sizes = [2, 32], strides = [1, 1]} : vector<2x128xf32> to vector<2x32xf32>
    %259 = math.tanh %258 : vector<2x32xf32>
    %260 = arith.mulf %256, %243 : vector<2x32xf32>
    %261 = arith.mulf %255, %259 : vector<2x32xf32>
    %262 = arith.addf %260, %261 : vector<2x32xf32>
    %263 = math.tanh %262 : vector<2x32xf32>
    %264 = arith.mulf %257, %263 : vector<2x32xf32>
    %265 = vector.extract_strided_slice %169 {offsets = [10, 0], sizes = [2, 128], strides = [1, 1]} : vector<16x128xf32> to vector<2x128xf32>
    %cst_42 = arith.constant dense<0.000000e+00> : vector<2x128xf32>
    %266 = tpu.matmul %264, %1, %cst_42 {dimension_numbers = #tpu.dot_dimension_numbers<[1], [0], [0], [1], [0, 0, 1, 1], [], []>} : vector<2x32xf32>, vector<32x128xf32>, vector<2x128xf32> -> vector<2x128xf32>
    %267 = arith.addf %265, %266 : vector<2x128xf32>
    %268 = vector.extract_strided_slice %267 {offsets = [0, 0], sizes = [2, 96], strides = [1, 1]} : vector<2x128xf32> to vector<2x96xf32>
    %269 = arith.negf %268 : vector<2x96xf32>
    %270 = math.exp %269 : vector<2x96xf32>
    %cst_43 = arith.constant 1.000000e+00 : f32
    %271 = vector.broadcast %cst_43 : f32 to vector<2x96xf32>
    %272 = arith.addf %271, %270 : vector<2x96xf32>
    %273 = arith.divf %271, %272 : vector<2x96xf32>
    %274 = vector.extract_strided_slice %273 {offsets = [0, 0], sizes = [2, 32], strides = [1, 1]} : vector<2x96xf32> to vector<2x32xf32>
    %275 = vector.extract_strided_slice %273 {offsets = [0, 32], sizes = [2, 32], strides = [1, 1]} : vector<2x96xf32> to vector<2x32xf32>
    %276 = vector.extract_strided_slice %273 {offsets = [0, 64], sizes = [2, 32], strides = [1, 1]} : vector<2x96xf32> to vector<2x32xf32>
    %277 = vector.extract_strided_slice %267 {offsets = [0, 96], sizes = [2, 32], strides = [1, 1]} : vector<2x128xf32> to vector<2x32xf32>
    %278 = math.tanh %277 : vector<2x32xf32>
    %279 = arith.mulf %275, %262 : vector<2x32xf32>
    %280 = arith.mulf %274, %278 : vector<2x32xf32>
    %281 = arith.addf %279, %280 : vector<2x32xf32>
    %282 = math.tanh %281 : vector<2x32xf32>
    %283 = arith.mulf %276, %282 : vector<2x32xf32>
    %284 = vector.extract_strided_slice %169 {offsets = [12, 0], sizes = [2, 128], strides = [1, 1]} : vector<16x128xf32> to vector<2x128xf32>
    %cst_44 = arith.constant dense<0.000000e+00> : vector<2x128xf32>
    %285 = tpu.matmul %283, %1, %cst_44 {dimension_numbers = #tpu.dot_dimension_numbers<[1], [0], [0], [1], [0, 0, 1, 1], [], []>} : vector<2x32xf32>, vector<32x128xf32>, vector<2x128xf32> -> vector<2x128xf32>
    %286 = arith.addf %284, %285 : vector<2x128xf32>
    %287 = vector.extract_strided_slice %286 {offsets = [0, 0], sizes = [2, 96], strides = [1, 1]} : vector<2x128xf32> to vector<2x96xf32>
    %288 = arith.negf %287 : vector<2x96xf32>
    %289 = math.exp %288 : vector<2x96xf32>
    %cst_45 = arith.constant 1.000000e+00 : f32
    %290 = vector.broadcast %cst_45 : f32 to vector<2x96xf32>
    %291 = arith.addf %290, %289 : vector<2x96xf32>
    %292 = arith.divf %290, %291 : vector<2x96xf32>
    %293 = vector.extract_strided_slice %292 {offsets = [0, 0], sizes = [2, 32], strides = [1, 1]} : vector<2x96xf32> to vector<2x32xf32>
    %294 = vector.extract_strided_slice %292 {offsets = [0, 32], sizes = [2, 32], strides = [1, 1]} : vector<2x96xf32> to vector<2x32xf32>
    %295 = vector.extract_strided_slice %292 {offsets = [0, 64], sizes = [2, 32], strides = [1, 1]} : vector<2x96xf32> to vector<2x32xf32>
    %296 = vector.extract_strided_slice %286 {offsets = [0, 96], sizes = [2, 32], strides = [1, 1]} : vector<2x128xf32> to vector<2x32xf32>
    %297 = math.tanh %296 : vector<2x32xf32>
    %298 = arith.mulf %294, %281 : vector<2x32xf32>
    %299 = arith.mulf %293, %297 : vector<2x32xf32>
    %300 = arith.addf %298, %299 : vector<2x32xf32>
    %301 = math.tanh %300 : vector<2x32xf32>
    %302 = arith.mulf %295, %301 : vector<2x32xf32>
    %303 = vector.extract_strided_slice %169 {offsets = [14, 0], sizes = [2, 128], strides = [1, 1]} : vector<16x128xf32> to vector<2x128xf32>
    %cst_46 = arith.constant dense<0.000000e+00> : vector<2x128xf32>
    %304 = tpu.matmul %302, %1, %cst_46 {dimension_numbers = #tpu.dot_dimension_numbers<[1], [0], [0], [1], [0, 0, 1, 1], [], []>} : vector<2x32xf32>, vector<32x128xf32>, vector<2x128xf32> -> vector<2x128xf32>
    %305 = arith.addf %303, %304 : vector<2x128xf32>
    %306 = vector.extract_strided_slice %305 {offsets = [0, 0], sizes = [2, 96], strides = [1, 1]} : vector<2x128xf32> to vector<2x96xf32>
    %307 = arith.negf %306 : vector<2x96xf32>
    %308 = math.exp %307 : vector<2x96xf32>
    %cst_47 = arith.constant 1.000000e+00 : f32
    %309 = vector.broadcast %cst_47 : f32 to vector<2x96xf32>
    %310 = arith.addf %309, %308 : vector<2x96xf32>
    %311 = arith.divf %309, %310 : vector<2x96xf32>
    %312 = vector.extract_strided_slice %311 {offsets = [0, 0], sizes = [2, 32], strides = [1, 1]} : vector<2x96xf32> to vector<2x32xf32>
    %313 = vector.extract_strided_slice %311 {offsets = [0, 32], sizes = [2, 32], strides = [1, 1]} : vector<2x96xf32> to vector<2x32xf32>
    %314 = vector.extract_strided_slice %311 {offsets = [0, 64], sizes = [2, 32], strides = [1, 1]} : vector<2x96xf32> to vector<2x32xf32>
    %315 = vector.extract_strided_slice %305 {offsets = [0, 96], sizes = [2, 32], strides = [1, 1]} : vector<2x128xf32> to vector<2x32xf32>
    %316 = math.tanh %315 : vector<2x32xf32>
    %317 = arith.mulf %313, %300 : vector<2x32xf32>
    %318 = arith.mulf %312, %316 : vector<2x32xf32>
    %319 = arith.addf %317, %318 : vector<2x32xf32>
    %320 = math.tanh %319 : vector<2x32xf32>
    %321 = arith.mulf %314, %320 : vector<2x32xf32>
    %322 = tpu.concatenate %188, %207, %226, %245, %264, %283, %302, %321 in 0 : vector<2x32xf32>, vector<2x32xf32>, vector<2x32xf32>, vector<2x32xf32>, vector<2x32xf32>, vector<2x32xf32>, vector<2x32xf32>, vector<2x32xf32> -> vector<16x32xf32>
    %cst_48 = arith.constant dense<0.000000e+00> : vector<16x128xf32>
    %323 = tpu.matmul %322, %3, %cst_48 {dimension_numbers = #tpu.dot_dimension_numbers<[1], [0], [0], [1], [0, 0, 1, 1], [], []>} : vector<16x32xf32>, vector<32x128xf32>, vector<16x128xf32> -> vector<16x128xf32>
    %324 = vector.broadcast %4 : vector<1x128xf32> to vector<16x128xf32>
    %325 = arith.addf %323, %324 : vector<16x128xf32>
    %c0_49 = arith.constant 0 : index
    %c0_50 = arith.constant 0 : index
    %326 = vector.load %arg7[%c0_49, %c0_50] : memref<16x128xf32, #tpu.memory_space<vmem>>, vector<16x128xf32>
    tpu.vector_store %arg7[%c0_49, %c0_50], %325 {strides = array<i32>} : memref<16x128xf32, #tpu.memory_space<vmem>>, vector<16x128xf32>,
    return
  }
}

</mosaic_0001>

<bundles_post_ra>
// kernel: bflstm_forward.1
= control target key start
LH: loop header
LB: loop body
LE: loop exit
PB: predicated region body
PF: predicated region fallthrough
CT: control target
= control target key end

     0   :  { %v1469_v12 = vmov 0.0   ;;  %s1470_s21 = smov 32   ;;  %s1471_s22 = smov 64   ;;  %vm79_vm4 = vcmask 261120   ;;  %vm626_vm13 = vcmask 1041408   ;;  %vm628_vm14 = vcmask 1043456   ;;  %s1928_s1 = inlined_call_operand.vmem [shape: f32[128,128], index: 1, kind: input, shape index: {}]   ;;  %s1929_s2 = inlined_call_operand.vmem [shape: f32[32,128], index: 2, kind: input, shape index: {}]   ;;  %s1930_s3 = inlined_call_operand.vmem [shape: f32[1,128], index: 3, kind: input, shape index: {}]   ;;  %s1931_s0 = inlined_call_operand.vmem [shape: f32[16,128], index: 0, kind: input, shape index: {}]   ;;  %s1932_s4 = inlined_call_operand.vmem [shape: f32[32,128], index: 4, kind: input, shape index: {}]   ;;  %s1933_s5 = inlined_call_operand.vmem [shape: f32[1,128], index: 5, kind: input, shape index: {}]   ;;  %s1934_s6 = inlined_call_operand.vmem [shape: f32[16,128], index: 6, kind: output, shape index: {0}]   ;;  %s1935_s7 = inlined_call_operand.vmem [shape: f32[16,128], index: 7, kind: output, shape index: {1}]  }
   0x1   :  { %v1515_v0 = vld [vmem:[%s1928_s1 + $0x78] sm:$0xff]  ;;  %v1520_v1 = vld [vmem:[%s1928_s1 + $0x70] sm:$0xff]  ;;  %v1526_v2 = vld [vmem:[%s1928_s1 + $0x68] sm:$0xff] }
   0x2   :  { %56 = vmatpush.msra.mxu0 %v1515_v0  ;;  %v1532_v3 = vld [vmem:[%s1928_s1 + $0x60] sm:$0xff]  ;;  %v1537_v4 = vld [vmem:[%s1929_s2 + $0x18] sm:$0xff]  ;;  %v1544_v5 = vld [vmem:[%s1929_s2 + $0x10] sm:$0xff] }
   0x3   :  { %95 = vmatpush.msra.mxu1 %v1537_v4  ;;  %v1549_v6 = vld [vmem:[%s1928_s1 + $0x58] sm:$0xff]  ;;  %v1554_v7 = vld [vmem:[%s1929_s2 + $0x8] sm:$0xff]  ;;  %158 = vmatpush.msra.mxu2 %v1537_v4  ;;  %v1563_v8 = vld [vmem:[%s1928_s1 + $0x50] sm:$0xff] }
   0x4   :  { %57 = vmatpush.msra.mxu0 %v1520_v1  ;;  %228 = vmatpush.msra.mxu3 %v1537_v4  ;;  %v1568_v9 = vld [vmem:[%s1929_s2] sm:$0xff]  ;;  %v1577_v10 = vld [vmem:[%s1928_s1 + $0x48] sm:$0xff]  ;;  %v1594_v13 = vld [vmem:[%s1928_s1 + $0x38] sm:$0xff] }
   0x5   :  { %96 = vmatpush.msra.mxu1 %v1544_v5  ;;  %159 = vmatpush.msra.mxu2 %v1544_v5  ;;  %v1586_v11 = vld [vmem:[%s1928_s1 + $0x40] sm:$0xff]  ;;  %v1603_v14 = vld [vmem:[%s1928_s1 + $0x30] sm:$0xff]  ;;  %v1612_v15 = vld [vmem:[%s1928_s1 + $0x28] sm:$0xff] }
   0x6   :  { %58 = vmatpush.msra.mxu0 %v1526_v2  ;;  %229 = vmatpush.msra.mxu3 %v1544_v5  ;;  %v1621_v16 = vld [vmem:[%s1928_s1 + $0x20] sm:$0xff]  ;;  %v1630_v17 = vld [vmem:[%s1928_s1 + $0x18] sm:$0xff]  ;;  %v1637_v18 = vld [vmem:[%s1928_s1 + $0x10] sm:$0xff] }
   0x7   :  { %97 = vmatpush.msra.mxu1 %v1554_v7  ;;  %160 = vmatpush.msra.mxu2 %v1554_v7  ;;  %v1644_v19 = vld [vmem:[%s1928_s1 + $0x8] sm:$0xff]  ;;  %v1651_v20 = vld [vmem:[%s1928_s1] sm:$0xff] }
   0x8   :  { %59 = vmatpush.msra.mxu0 %v1532_v3  ;;  %230 = vmatpush.msra.mxu3 %v1554_v7  ;;  %v51_v21 = vld [vmem:[%s1931_s0] sm:$0xff] }
   0x9   :  { %98 = vmatpush.msra.mxu1 %v1568_v9  ;;  %161 = vmatpush.msra.mxu2 %v1568_v9  ;;  %v1670_v22 = vld [vmem:[%s1930_s3] ss:$0 sm:$0xff] }
   0xa   :  { %60 = vmatpush.msra.mxu0 %v1549_v6  ;;  %99 = vmatmul.f32.vlgmr.msra.gmra.mxu1 %v1469_v12 }
   0xb   :  { %231 = vmatpush.msra.mxu3 %v1568_v9  ;;  %298 = vmatpush.msrb.mxu1 %v1537_v4 }
   0xc   :  { %61 = vmatpush.msra.mxu0 %v1563_v8  ;;  %368 = vmatpush.msrb.mxu2 %v1537_v4 }
   0xd   :  { %434 = vmatpush.msrb.mxu3 %v1537_v4  ;;  %299 = vmatpush.msrb.mxu1 %v1544_v5 }
   0xe   :  { %62 = vmatpush.msra.mxu0 %v1577_v10  ;;  %369 = vmatpush.msrb.mxu2 %v1544_v5 }
   0xf   :  { %435 = vmatpush.msrb.mxu3 %v1544_v5  ;;  %300 = vmatpush.msrb.mxu1 %v1554_v7 }
  0x10   :  { %63 = vmatpush.msra.mxu0 %v1586_v11  ;;  %370 = vmatpush.msrb.mxu2 %v1554_v7 }
  0x11   :  { %436 = vmatpush.msrb.mxu3 %v1554_v7  ;;  %301 = vmatpush.msrb.mxu1 %v1568_v9 }
  0x12   :  { %64 = vmatpush.msra.mxu0 %v1594_v13  ;;  %371 = vmatpush.msrb.mxu2 %v1568_v9 }
  0x13   :  { %437 = vmatpush.msrb.mxu3 %v1568_v9  ;;  %504 = vmatpush.msra.mxu1 %v1537_v4 }
  0x14   :  { %65 = vmatpush.msra.mxu0 %v1603_v14 }
  0x15   :  { %505 = vmatpush.msra.mxu1 %v1544_v5 }
  0x16   :  { %66 = vmatpush.msra.mxu0 %v1612_v15 }
  0x17   :  { %506 = vmatpush.msra.mxu1 %v1554_v7 }
  0x18   :  { %67 = vmatpush.msra.mxu0 %v1621_v16 }
  0x19   :  { %507 = vmatpush.msra.mxu1 %v1568_v9 }
  0x1a   :  { %68 = vmatpush.msra.mxu0 %v1630_v17 }
  0x1c   :  { %69 = vmatpush.msra.mxu0 %v1637_v18 }
  0x1e   :  { %70 = vmatpush.msra.mxu0 %v1644_v19 }
  0x20   :  { %71 = vmatpush.msra.mxu0 %v1651_v20 }
  0x21   :  { %72 = vmatmul.f32.vlgmr.msra.gmra.mxu0 %v51_v21 }
  0x22   :  { %920 = vmatpush.msrb.mxu0 %v1537_v4 }
  0x24   :  { %921 = vmatpush.msrb.mxu0 %v1544_v5 }
  0x26   :  { %922 = vmatpush.msrb.mxu0 %v1554_v7 }
  0x28   :  { %923 = vmatpush.msrb.mxu0 %v1568_v9 }
  0x2a   :  { %1126 = vmatpush.msra.mxu0 %v1537_v4 }
  0x2c   :  { %1127 = vmatpush.msra.mxu0 %v1544_v5 }
  0x2e   :  { %1128 = vmatpush.msra.mxu0 %v1554_v7 }
  0x30   :  { %1129 = vmatpush.msra.mxu0 %v1568_v9 }
  0x87   :  { %v100_v24 = vpop.f32.mrf.mxu1 }
  0x9e   :  { %v73_v23 = vpop.f32.mrf.mxu0 }
  0x9f   :  { %v1673_v25 = vadd.f32 %v1670_v22, %v73_v23 }
  0xa1   :  { %v103_v26 = vadd.f32 %v100_v24, %v1673_v25 }
  0xa3   :  { %1337 = vtanh.f32 %v103_v26  ;;  %v1297_v28 = vmul.f32 -1.442695, %v103_v26 }
  0xa5   :  { %1339 = vpow2.f32 %v1297_v28 }
  0xa9   :  { %v1338_v27 = vpop.eup %1337 }
  0xaa   :  { %126 = vrot.lane.b32.xlu0 %v1338_v27, %s1470_s21 }
  0xab   :  { %v1340_v29 = vpop.eup %1339 }
  0xac   :  { %v107_v30 = vadd.f32 1.0, %v1340_v29 }
  0xae   :  { %1341 = vrcp.f32 %v107_v30  ;;  %v119_v36 = vand.u32 2147483648, %v107_v30  ;;  %vm113_vm1 = vweird.f32 %v107_v30  ;;  %v117_v37 = vand.u32 2147483647, %v107_v30 }
  0xb0   :  { %v120_v39 = vor.u32 1.1754944e-38, %v119_v36  ;;  %vm118_vm3 = vcmp.eq.f32.partialorder %v117_v37, 8.507059e+37 }
  0xb4   :  { %v1342_v31 = vpop.eup %1341 }
  0xb5   :  { %v109_v32 = vmul.f32 %v1342_v31, %v107_v30  ;;  %vm114_vm0 = vweird.f32 %v1342_v31 }
  0xb6   :  { %vm115_vm2 = vmor %vm113_vm1, %vm114_vm0 }
  0xb7   :  { %v110_v33 = vsub.f32 1.0, %v109_v32 }
  0xb9   :  { %v111_v34 = vmul.f32 %v1342_v31, %v110_v33 }
  0xbb   :  { %v112_v35 = vadd.f32 %v1342_v31, %v111_v34 }
  0xbd   :  { %v116_v38 = vsel %vm115_vm2, %v1342_v31, %v112_v35 }
  0xbe   :  { %v121_v41 = vsel %vm118_vm3, %v120_v39, %v116_v38  ;;  %vm630_vm3 = vcmask 1045504  }
  0xbf   :  { %v124_v43 = vmul.f32 0.0, %v121_v41 }
 0x11c   :  { %v127_v40 = vpop.permute.xlu0 %126 }
 0x11d   :  { %v129_v42 = vmul.f32 %v127_v40, %v121_v41 }
 0x11f   :  { %131 = vrot.lane.b32.xlu0 %v129_v42, %s1470_s21 }
 0x191   :  { %v132_v44 = vpop.permute.xlu0 %131 }
 0x192   :  { %v134_v45 = vadd.f32 %v132_v44, %v124_v43 }
 0x194   :  { %1343 = vtanh.f32 %v134_v45  ;;  %v191_v27 = vrot.slane %v134_v45, 6 }
 0x19a   :  { %v1344_v46 = vpop.eup %1343 }
 0x19b   :  { %137 = vrot.lane.b32.xlu1 %v1344_v46, %s1470_s21 }
 0x20d   :  { %v138_v47 = vpop.permute.xlu1 %137 }
 0x20e   :  { %v1679_v48 = vmul.f32 %v138_v47, %v121_v41 }
 0x210   :  { %142 = vrot.lane.b32.xlu1 %v1679_v48, %s1471_s22 }
 0x282   :  { %v143_v49 = vpop.permute.xlu1 %142 }
 0x283   :  { %1298 = vmatmul.msk.f32.vlgmr.msra.gmra.mxu2 %vm79_vm4, %v143_v49 }
 0x284   :  { %574 = vmatpush.msra.mxu2 %v1537_v4 }
 0x286   :  { %575 = vmatpush.msra.mxu2 %v1544_v5 }
 0x288   :  { %576 = vmatpush.msra.mxu2 %v1554_v7 }
 0x28a   :  { %577 = vmatpush.msra.mxu2 %v1568_v9 }
 0x306   :  { %v163_v50 = vpop.f32.mrf.mxu2 }
 0x307   :  { %v167_v51 = vrot.slane %v163_v50, 6 }
 0x309   :  { %v169_v52 = vadd.f32 %v167_v51, %v1673_v25 }
 0x30b   :  { %1345 = vtanh.f32 %v169_v52  ;;  %v1299_v54 = vmul.f32 -1.442695, %v169_v52 }
 0x30d   :  { %1347 = vpow2.f32 %v1299_v54 }
 0x311   :  { %v1346_v53 = vpop.eup %1345 }
 0x312   :  { %195 = vrot.lane.b32.xlu2 %v1346_v53, %s1470_s21 }
 0x313   :  { %v1348_v55 = vpop.eup %1347 }
 0x314   :  { %v173_v56 = vadd.f32 1.0, %v1348_v55 }
 0x316   :  { %1349 = vrcp.f32 %v173_v56  ;;  %v185_v62 = vand.u32 2147483648, %v173_v56  ;;  %vm179_vm6 = vweird.f32 %v173_v56  ;;  %v183_v63 = vand.u32 2147483647, %v173_v56 }
 0x318   :  { %v186_v21 = vor.u32 1.1754944e-38, %v185_v62  ;;  %vm184_vm8 = vcmp.eq.f32.partialorder %v183_v63, 8.507059e+37 }
 0x31c   :  { %v1350_v57 = vpop.eup %1349 }
 0x31d   :  { %v175_v58 = vmul.f32 %v1350_v57, %v173_v56  ;;  %vm180_vm5 = vweird.f32 %v1350_v57 }
 0x31e   :  { %vm181_vm7 = vmor %vm179_vm6, %vm180_vm5 }
 0x31f   :  { %v176_v59 = vsub.f32 1.0, %v175_v58 }
 0x321   :  { %v177_v60 = vmul.f32 %v1350_v57, %v176_v59 }
 0x323   :  { %v178_v61 = vadd.f32 %v1350_v57, %v177_v60 }
 0x325   :  { %v182_v12 = vsel %vm181_vm7, %v1350_v57, %v178_v61 }
 0x326   :  { %v187_v24 = vsel %vm184_vm8, %v186_v21, %v182_v12 }
 0x327   :  { %v193_v28 = vmul.f32 %v191_v27, %v187_v24 }
 0x36c   :  { %v196_v23 = vpop.permute.xlu2 %195 }
 0x36d   :  { %v198_v26 = vmul.f32 %v196_v23, %v187_v24 }
 0x36f   :  { %200 = vrot.lane.b32.xlu2 %v198_v26, %s1470_s21 }
 0x3c9   :  { %v201_v29 = vpop.permute.xlu2 %200 }
 0x3ca   :  { %v203_v30 = vadd.f32 %v201_v29, %v193_v28 }
 0x3cc   :  { %1351 = vtanh.f32 %v203_v30  ;;  %v261_v56 = vrot.slane %v203_v30, 6 }
 0x3d2   :  { %v1352_v31 = vpop.eup %1351 }
 0x3d3   :  { %206 = vrot.lane.b32.xlu0 %v1352_v31, %s1470_s21 }
 0x445   :  { %v207_v32 = vpop.permute.xlu0 %206 }
 0x446   :  { %v209_v33 = vmul.f32 %v207_v32, %v187_v24 }
 0x448   :  { %v211_v34 = vrot.slane %v209_v33, 2  ;;  %v627_v63 = vsel %vm626_vm13, %v1679_v48, %v209_v33 }
 0x44a   :  { %212 = vrot.lane.b32.xlu1 %v211_v34, %s1471_s22 }
 0x4bc   :  { %v213_v35 = vpop.permute.xlu1 %212 }
 0x4bd   :  { %1300 = vmatmul.msk.f32.vlgmr.msra.gmra.mxu3 %vm79_vm4, %v213_v35  ;;  %v52_v35 = vld [vmem:[%s1931_s0 + $0x8] sm:$0xff] }
 0x4be   :  { %75 = vmatmul.f32.gmra.mxu0 %v52_v35 }
 0x540   :  { %v233_v36 = vpop.f32.mrf.mxu3 }
 0x541   :  { %v237_v37 = vrot.slane %v233_v36, 4 }
 0x543   :  { %v239_v38 = vadd.f32 %v237_v37, %v1673_v25  ;;  %v76_v37 = vpop.f32.mrf.mxu0 }
 0x545   :  { %1353 = vtanh.f32 %v239_v38  ;;  %v1301_v40 = vmul.f32 -1.442695, %v239_v38  ;;  %v1736_v38 = vadd.f32 %v1670_v22, %v76_v37 }
 0x547   :  { %1355 = vpow2.f32 %v1301_v40 }
 0x54b   :  { %v1354_v39 = vpop.eup %1353 }
 0x54c   :  { %265 = vrot.lane.b32.xlu2 %v1354_v39, %s1470_s21 }
 0x54d   :  { %v1356_v41 = vpop.eup %1355 }
 0x54e   :  { %v243_v42 = vadd.f32 1.0, %v1356_v41 }
 0x550   :  { %1357 = vrcp.f32 %v243_v42  ;;  %v255_v49 = vand.u32 2147483648, %v243_v42  ;;  %vm249_vm10 = vweird.f32 %v243_v42  ;;  %v253_v50 = vand.u32 2147483647, %v243_v42 }
 0x552   :  { %v256_v52 = vor.u32 1.1754944e-38, %v255_v49  ;;  %vm254_vm12 = vcmp.eq.f32.partialorder %v253_v50, 8.507059e+37 }
 0x556   :  { %v1358_v43 = vpop.eup %1357 }
 0x557   :  { %v245_v44 = vmul.f32 %v1358_v43, %v243_v42  ;;  %vm250_vm9 = vweird.f32 %v1358_v43 }
 0x558   :  { %vm251_vm11 = vmor %vm249_vm10, %vm250_vm9 }
 0x559   :  { %v246_v45 = vsub.f32 1.0, %v245_v44 }
 0x55b   :  { %v247_v46 = vmul.f32 %v1358_v43, %v246_v45 }
 0x55d   :  { %v248_v47 = vadd.f32 %v1358_v43, %v247_v46 }
 0x55f   :  { %v252_v51 = vsel %vm251_vm11, %v1358_v43, %v248_v47 }
 0x560   :  { %v257_v54 = vsel %vm254_vm12, %v256_v52, %v252_v51 }
 0x561   :  { %v263_v57 = vmul.f32 %v261_v56, %v257_v54 }
 0x5a6   :  { %v266_v53 = vpop.permute.xlu2 %265 }
 0x5a7   :  { %v268_v55 = vmul.f32 %v266_v53, %v257_v54 }
 0x5a9   :  { %270 = vrot.lane.b32.xlu0 %v268_v55, %s1470_s21 }
 0x61b   :  { %v271_v58 = vpop.permute.xlu0 %270 }
 0x61c   :  { %v273_v59 = vadd.f32 %v271_v58, %v263_v57 }
 0x61e   :  { %1359 = vtanh.f32 %v273_v59  ;;  %v331_v26 = vrot.slane %v273_v59, 6 }
 0x624   :  { %v1360_v60 = vpop.eup %1359 }
 0x625   :  { %276 = vrot.lane.b32.xlu1 %v1360_v60, %s1470_s21 }
 0x697   :  { %v277_v61 = vpop.permute.xlu1 %276 }
 0x698   :  { %v279_v62 = vmul.f32 %v277_v61, %v257_v54 }
 0x69a   :  { %v281_v12 = vrot.slane %v279_v62, 4  ;;  %v629_v21 = vsel %vm628_vm14, %v627_v63, %v279_v62 }
 0x69c   :  { %282 = vrot.lane.b32.xlu2 %v281_v12, %s1471_s22 }
 0x6f6   :  { %v283_v23 = vpop.permute.xlu2 %282 }
 0x6f7   :  { %1302 = vmatmul.msk.f32.vlgmr.msrb.gmra.mxu1 %vm79_vm4, %v283_v23 }
 0x6f8   :  { %673 = vmatpush.msrb.mxu1 %v1515_v0 }
 0x6fa   :  { %674 = vmatpush.msrb.mxu1 %v1520_v1 }
 0x6fc   :  { %675 = vmatpush.msrb.mxu1 %v1526_v2 }
 0x6fe   :  { %676 = vmatpush.msrb.mxu1 %v1532_v3 }
 0x700   :  { %677 = vmatpush.msrb.mxu1 %v1549_v6 }
 0x702   :  { %678 = vmatpush.msrb.mxu1 %v1563_v8 }
 0x704   :  { %679 = vmatpush.msrb.mxu1 %v1577_v10 }
 0x706   :  { %680 = vmatpush.msrb.mxu1 %v1586_v11 }
 0x708   :  { %681 = vmatpush.msrb.mxu1 %v1594_v13 }
 0x70a   :  { %682 = vmatpush.msrb.mxu1 %v1603_v14 }
 0x70c   :  { %683 = vmatpush.msrb.mxu1 %v1612_v15 }
 0x70e   :  { %684 = vmatpush.msrb.mxu1 %v1621_v16 }
 0x710   :  { %685 = vmatpush.msrb.mxu1 %v1630_v17 }
 0x712   :  { %686 = vmatpush.msrb.mxu1 %v1637_v18 }
 0x714   :  { %687 = vmatpush.msrb.mxu1 %v1644_v19 }
 0x716   :  { %688 = vmatpush.msrb.mxu1 %v1651_v20 }
 0x774   :  { %v303_v0 = vpop.f32.mrf.mxu1 }
 0x775   :  { %v307_v1 = vrot.slane %v303_v0, 2 }
 0x777   :  { %v309_v2 = vadd.f32 %v307_v1, %v1673_v25 }
 0x779   :  { %1361 = vtanh.f32 %v309_v2  ;;  %v1303_v6 = vmul.f32 -1.442695, %v309_v2 }
 0x77b   :  { %1363 = vpow2.f32 %v1303_v6 }
 0x77f   :  { %v1362_v3 = vpop.eup %1361 }
 0x780   :  { %335 = vrot.lane.b32.xlu0 %v1362_v3, %s1470_s21 }
 0x781   :  { %v1364_v8 = vpop.eup %1363 }
 0x782   :  { %v313_v10 = vadd.f32 1.0, %v1364_v8 }
 0x784   :  { %1365 = vrcp.f32 %v313_v10  ;;  %v325_v17 = vand.u32 2147483648, %v313_v10  ;;  %vm319_vm0 = vweird.f32 %v313_v10  ;;  %v323_v18 = vand.u32 2147483647, %v313_v10 }
 0x786   :  { %v326_v20 = vor.u32 1.1754944e-38, %v325_v17  ;;  %vm324_vm2 = vcmp.eq.f32.partialorder %v323_v18, 8.507059e+37 }
 0x78a   :  { %v1366_v11 = vpop.eup %1365 }
 0x78b   :  { %v315_v13 = vmul.f32 %v1366_v11, %v313_v10  ;;  %vm320_vm15 = vweird.f32 %v1366_v11 }
 0x78c   :  { %vm321_vm1 = vmor %vm319_vm0, %vm320_vm15 }
 0x78d   :  { %v316_v14 = vsub.f32 1.0, %v315_v13 }
 0x78f   :  { %v317_v15 = vmul.f32 %v1366_v11, %v316_v14 }
 0x791   :  { %v318_v16 = vadd.f32 %v1366_v11, %v317_v15 }
 0x793   :  { %v322_v19 = vsel %vm321_vm1, %v1366_v11, %v318_v16 }
 0x794   :  { %v327_v48 = vsel %vm324_vm2, %v326_v20, %v322_v19 }
 0x795   :  { %v333_v27 = vmul.f32 %v331_v26, %v327_v48 }
 0x7f2   :  { %v336_v25 = vpop.permute.xlu0 %335 }
 0x7f3   :  { %v338_v24 = vmul.f32 %v336_v25, %v327_v48 }
 0x7f5   :  { %340 = vrot.lane.b32.xlu1 %v338_v24, %s1470_s21 }
 0x867   :  { %v341_v28 = vpop.permute.xlu1 %340 }
 0x868   :  { %v343_v29 = vadd.f32 %v341_v28, %v333_v27 }
 0x86a   :  { %1367 = vtanh.f32 %v343_v29  ;;  %v398_v58 = vrot.slane %v343_v29, 6 }
 0x870   :  { %v1368_v30 = vpop.eup %1367 }
 0x871   :  { %346 = vrot.lane.b32.xlu2 %v1368_v30, %s1470_s21 }
 0x8cb   :  { %v347_v31 = vpop.permute.xlu2 %346 }
 0x8cc   :  { %v349_v32 = vmul.f32 %v347_v31, %v327_v48 }
 0x8ce   :  { %v351_v33 = vrot.slane %v349_v32, 6  ;;  %v1724_v34 = vsel %vm630_vm3, %v629_v21, %v349_v32 }
 0x8d0   :  { %352 = vrot.lane.b32.xlu0 %v351_v33, %s1471_s22 }
 0x942   :  { %v353_v36 = vpop.permute.xlu0 %352 }
 0x943   :  { %1304 = vmatmul.msk.f32.vlgmr.msrb.gmra.mxu2 %vm79_vm4, %v353_v36 }
 0x944   :  { %714 = vmatpush.msrb.mxu2 %v1537_v4 }
 0x946   :  { %715 = vmatpush.msrb.mxu2 %v1544_v5 }
 0x948   :  { %716 = vmatpush.msrb.mxu2 %v1554_v7 }
 0x94a   :  { %717 = vmatpush.msrb.mxu2 %v1568_v9 }
 0x9c6   :  { %v373_v39 = vpop.f32.mrf.mxu2 }
 0x9c7   :  { %v376_v40 = vadd.f32 %v373_v39, %v1736_v38 }
 0x9c9   :  { %1369 = vtanh.f32 %v376_v40  ;;  %v1305_v42 = vmul.f32 -1.442695, %v376_v40 }
 0x9cb   :  { %1371 = vpow2.f32 %v1305_v42 }
 0x9cf   :  { %v1370_v41 = vpop.eup %1369 }
 0x9d0   :  { %402 = vrot.lane.b32.xlu1 %v1370_v41, %s1470_s21 }
 0x9d1   :  { %v1372_v43 = vpop.eup %1371 }
 0x9d2   :  { %v380_v44 = vadd.f32 1.0, %v1372_v43 }
 0x9d4   :  { %1373 = vrcp.f32 %v380_v44  ;;  %v392_v51 = vand.u32 2147483648, %v380_v44  ;;  %vm386_vm6 = vweird.f32 %v380_v44  ;;  %v390_v52 = vand.u32 2147483647, %v380_v44 }
 0x9d6   :  { %v393_v54 = vor.u32 1.1754944e-38, %v392_v51  ;;  %vm391_vm8 = vcmp.eq.f32.partialorder %v390_v52, 8.507059e+37 }
 0x9da   :  { %v1374_v45 = vpop.eup %1373 }
 0x9db   :  { %v382_v46 = vmul.f32 %v1374_v45, %v380_v44  ;;  %vm387_vm5 = vweird.f32 %v1374_v45 }
 0x9dc   :  { %vm388_vm7 = vmor %vm386_vm6, %vm387_vm5 }
 0x9dd   :  { %v383_v47 = vsub.f32 1.0, %v382_v46 }
 0x9df   :  { %v384_v49 = vmul.f32 %v1374_v45, %v383_v47 }
 0x9e1   :  { %v385_v50 = vadd.f32 %v1374_v45, %v384_v49 }
 0x9e3   :  { %v389_v53 = vsel %vm388_vm7, %v1374_v45, %v385_v50 }
 0x9e4   :  { %v394_v56 = vsel %vm391_vm8, %v393_v54, %v389_v53 }
 0x9e5   :  { %v400_v59 = vmul.f32 %v398_v58, %v394_v56 }
 0xa42   :  { %v403_v55 = vpop.permute.xlu1 %402 }
 0xa43   :  { %v405_v57 = vmul.f32 %v403_v55, %v394_v56 }
 0xa45   :  { %407 = vrot.lane.b32.xlu2 %v405_v57, %s1470_s21 }
 0xa9f   :  { %v408_v60 = vpop.permute.xlu2 %407 }
 0xaa0   :  { %v410_v61 = vadd.f32 %v408_v60, %v400_v59 }
 0xaa2   :  { %1375 = vtanh.f32 %v410_v61  ;;  %v467_v24 = vrot.slane %v410_v61, 6  ;;  %v1765_v61 = vld [vmem:[%s1932_s4 + $0x18] sm:$0xff] }
 0xaa3   :  { %660 = vmatpush.msra.mxu3 %v1765_v61 }
 0xaa8   :  { %v1376_v62 = vpop.eup %1375 }
 0xaa9   :  { %413 = vrot.lane.b32.xlu0 %v1376_v62, %s1470_s21  ;;  %v1771_v62 = vld [vmem:[%s1932_s4 + $0x10] sm:$0xff] }
 0xaaa   :  { %661 = vmatpush.msra.mxu3 %v1771_v62 }
 0xb1b   :  { %v414_v63 = vpop.permute.xlu0 %413 }
 0xb1c   :  { %v1742_v12 = vmul.f32 %v414_v63, %v394_v56  ;;  %v1777_v63 = vld [vmem:[%s1932_s4 + $0x8] sm:$0xff] }
 0xb1d   :  { %662 = vmatpush.msra.mxu3 %v1777_v63 }
 0xb1e   :  { %418 = vrot.lane.b32.xlu1 %v1742_v12, %s1471_s22 }
 0xb90   :  { %v419_v21 = vpop.permute.xlu1 %418 }
 0xb91   :  { %1306 = vmatmul.msk.f32.vlgmr.msrb.gmra.mxu3 %vm79_vm4, %v419_v21 }
 0xc14   :  { %v439_v23 = vpop.f32.mrf.mxu3 }
 0xc15   :  { %v443_v0 = vrot.slane %v439_v23, 6 }
 0xc17   :  { %v445_v1 = vadd.f32 %v443_v0, %v1736_v38 }
 0xc19   :  { %1377 = vtanh.f32 %v445_v1  ;;  %v1307_v3 = vmul.f32 -1.442695, %v445_v1 }
 0xc1b   :  { %1379 = vpow2.f32 %v1307_v3 }
 0xc1f   :  { %v1378_v2 = vpop.eup %1377 }
 0xc20   :  { %471 = vrot.lane.b32.xlu2 %v1378_v2, %s1470_s21 }
 0xc21   :  { %v1380_v6 = vpop.eup %1379 }
 0xc22   :  { %v449_v8 = vadd.f32 1.0, %v1380_v6 }
 0xc24   :  { %1381 = vrcp.f32 %v449_v8  ;;  %v461_v16 = vand.u32 2147483648, %v449_v8  ;;  %vm455_vm10 = vweird.f32 %v449_v8  ;;  %v459_v17 = vand.u32 2147483647, %v449_v8 }
 0xc26   :  { %v462_v19 = vor.u32 1.1754944e-38, %v461_v16  ;;  %vm460_vm12 = vcmp.eq.f32.partialorder %v459_v17, 8.507059e+37 }
 0xc2a   :  { %v1382_v10 = vpop.eup %1381 }
 0xc2b   :  { %v451_v11 = vmul.f32 %v1382_v10, %v449_v8  ;;  %vm456_vm9 = vweird.f32 %v1382_v10 }
 0xc2c   :  { %vm457_vm11 = vmor %vm455_vm10, %vm456_vm9 }
 0xc2d   :  { %v452_v13 = vsub.f32 1.0, %v451_v11 }
 0xc2f   :  { %v453_v14 = vmul.f32 %v1382_v10, %v452_v13 }
 0xc31   :  { %v454_v15 = vadd.f32 %v1382_v10, %v453_v14 }
 0xc33   :  { %v458_v18 = vsel %vm457_vm11, %v1382_v10, %v454_v15 }
 0xc34   :  { %v463_v25 = vsel %vm460_vm12, %v462_v19, %v458_v18 }
 0xc35   :  { %v469_v26 = vmul.f32 %v467_v24, %v463_v25 }
 0xc7a   :  { %v472_v20 = vpop.permute.xlu2 %471 }
 0xc7b   :  { %v474_v48 = vmul.f32 %v472_v20, %v463_v25 }
 0xc7d   :  { %476 = vrot.lane.b32.xlu0 %v474_v48, %s1470_s21 }
 0xcef   :  { %v477_v27 = vpop.permute.xlu0 %476 }
 0xcf0   :  { %v479_v28 = vadd.f32 %v477_v27, %v469_v26 }
 0xcf2   :  { %1383 = vtanh.f32 %v479_v28  ;;  %v537_v56 = vrot.slane %v479_v28, 6 }
 0xcf8   :  { %v1384_v29 = vpop.eup %1383 }
 0xcf9   :  { %482 = vrot.lane.b32.xlu1 %v1384_v29, %s1470_s21 }
 0xd6b   :  { %v483_v30 = vpop.permute.xlu1 %482 }
 0xd6c   :  { %v485_v31 = vmul.f32 %v483_v30, %v463_v25 }
 0xd6e   :  { %v487_v32 = vrot.slane %v485_v31, 2  ;;  %v632_v0 = vsel %vm626_vm13, %v1742_v12, %v485_v31  ;;  %v1807_v12 = vld [vmem:[%s1933_s5] ss:$0 sm:$0xff] }
 0xd70   :  { %488 = vrot.lane.b32.xlu2 %v487_v32, %s1471_s22 }
 0xdca   :  { %v489_v33 = vpop.permute.xlu2 %488 }
 0xdcb   :  { %1308 = vmatmul.msk.f32.vlgmr.msra.gmra.mxu1 %vm79_vm4, %v489_v33 }
 0xe48   :  { %v509_v35 = vpop.f32.mrf.mxu1 }
 0xe49   :  { %v513_v36 = vrot.slane %v509_v35, 4 }
 0xe4b   :  { %v515_v37 = vadd.f32 %v513_v36, %v1736_v38 }
 0xe4d   :  { %1385 = vtanh.f32 %v515_v37  ;;  %v1309_v40 = vmul.f32 -1.442695, %v515_v37 }
 0xe4f   :  { %1387 = vpow2.f32 %v1309_v40 }
 0xe53   :  { %v1386_v39 = vpop.eup %1385 }
 0xe54   :  { %541 = vrot.lane.b32.xlu0 %v1386_v39, %s1470_s21 }
 0xe55   :  { %v1388_v41 = vpop.eup %1387 }
 0xe56   :  { %v519_v42 = vadd.f32 1.0, %v1388_v41 }
 0xe58   :  { %1389 = vrcp.f32 %v519_v42  ;;  %v531_v49 = vand.u32 2147483648, %v519_v42  ;;  %vm525_vm0 = vweird.f32 %v519_v42  ;;  %v529_v50 = vand.u32 2147483647, %v519_v42 }
 0xe5a   :  { %v532_v52 = vor.u32 1.1754944e-38, %v531_v49  ;;  %vm530_vm2 = vcmp.eq.f32.partialorder %v529_v50, 8.507059e+37 }
 0xe5e   :  { %v1390_v43 = vpop.eup %1389 }
 0xe5f   :  { %v521_v44 = vmul.f32 %v1390_v43, %v519_v42  ;;  %vm526_vm15 = vweird.f32 %v1390_v43 }
 0xe60   :  { %vm527_vm1 = vmor %vm525_vm0, %vm526_vm15 }
 0xe61   :  { %v522_v45 = vsub.f32 1.0, %v521_v44 }
 0xe63   :  { %v523_v46 = vmul.f32 %v1390_v43, %v522_v45 }
 0xe65   :  { %v524_v47 = vadd.f32 %v1390_v43, %v523_v46 }
 0xe67   :  { %v528_v51 = vsel %vm527_vm1, %v1390_v43, %v524_v47 }
 0xe68   :  { %v533_v54 = vsel %vm530_vm2, %v532_v52, %v528_v51 }
 0xe69   :  { %v539_v57 = vmul.f32 %v537_v56, %v533_v54 }
 0xec6   :  { %v542_v53 = vpop.permute.xlu0 %541 }
 0xec7   :  { %v544_v55 = vmul.f32 %v542_v53, %v533_v54 }
 0xec9   :  { %546 = vrot.lane.b32.xlu1 %v544_v55, %s1470_s21 }
 0xf3b   :  { %v547_v58 = vpop.permute.xlu1 %546 }
 0xf3c   :  { %v1756_v59 = vadd.f32 %v547_v58, %v539_v57 }
 0xf3e   :  { %1391 = vtanh.f32 %v1756_v59  ;;  %v607_v32 = vrot.slane %v1756_v59, 6 }
 0xf44   :  { %v1392_v60 = vpop.eup %1391 }
 0xf45   :  { %552 = vrot.lane.b32.xlu2 %v1392_v60, %s1470_s21 }
 0xf4d   :  { %640 = vrot.lane.b32.xlu2 %v1724_v34, %s1471_s22  ;;  %v1782_v34 = vld [vmem:[%s1932_s4] sm:$0xff] }
 0xf4e   :  { %663 = vmatpush.msra.mxu3 %v1782_v34 }
 0xf50   :  { %850 = vmatpush.msrb.mxu3 %v1537_v4 }
 0xf52   :  { %851 = vmatpush.msrb.mxu3 %v1544_v5 }
 0xf54   :  { %852 = vmatpush.msrb.mxu3 %v1554_v7 }
 0xf56   :  { %853 = vmatpush.msrb.mxu3 %v1568_v9 }
 0xf9f   :  { %v553_v21 = vpop.permute.xlu2 %552 }
 0xfa0   :  { %v555_v23 = vmul.f32 %v553_v21, %v533_v54 }
 0xfa2   :  { %v557_v1 = vrot.slane %v555_v23, 4  ;;  %v633_v2 = vsel %vm628_vm14, %v632_v0, %v555_v23 }
 0xfa4   :  { %558 = vrot.lane.b32.xlu0 %v557_v1, %s1471_s22 }
 0xfa7   :  { %v641_v3 = vpop.permute.xlu2 %640 }
 0xfa8   :  { %1312 = vmatmul.msk.f32.vlgmr.msra.gmra.mxu3 %vm79_vm4, %v641_v3 }
 0xfa9   :  { %1056 = vmatpush.msra.mxu3 %v1537_v4 }
 0xfab   :  { %1057 = vmatpush.msra.mxu3 %v1544_v5 }
 0xfad   :  { %1058 = vmatpush.msra.mxu3 %v1554_v7 }
 0xfaf   :  { %1059 = vmatpush.msra.mxu3 %v1568_v9 }
0x1016   :  { %v559_v6 = vpop.permute.xlu0 %558 }
0x1017   :  { %1310 = vmatmul.msk.f32.vlgmr.msra.gmra.mxu2 %vm79_vm4, %v559_v6 }
0x1018   :  { %780 = vmatpush.msra.mxu2 %v1537_v4 }
0x101a   :  { %781 = vmatpush.msra.mxu2 %v1544_v5 }
0x101c   :  { %782 = vmatpush.msra.mxu2 %v1554_v7 }
0x101e   :  { %783 = vmatpush.msra.mxu2 %v1568_v9 }
0x102b   :  { %v665_v8 = vpop.f32.mrf.mxu3 }
0x102c   :  { %v666_v10 = vadd.f32 %v1807_v12, %v665_v8 }
0x102e   :  { %671 = vst [vmem:[%s1934_s6] sm:$0xff] %v666_v10  ;;  %689 = vmatmul.f32.vlgmr.msrb.gmra.mxu1 %v666_v10  ;;  %v1465_v10 = vld [vmem:[%s1929_s2 + $0x18] sm:$0xff] }
0x109a   :  { %v579_v11 = vpop.f32.mrf.mxu2 }
0x109b   :  { %v583_v13 = vrot.slane %v579_v11, 2  ;;  %v1466_v11 = vld [vmem:[%s1929_s2 + $0x10] sm:$0xff] }
0x109d   :  { %v585_v14 = vadd.f32 %v583_v13, %v1736_v38  ;;  %v1467_v13 = vld [vmem:[%s1929_s2 + $0x8] sm:$0xff] }
0x109f   :  { %1393 = vtanh.f32 %v585_v14  ;;  %v1311_v16 = vmul.f32 -1.442695, %v585_v14 }
0x10a1   :  { %1395 = vpow2.f32 %v1311_v16 }
0x10a5   :  { %v1394_v15 = vpop.eup %1393 }
0x10a6   :  { %611 = vrot.lane.b32.xlu1 %v1394_v15, %s1470_s21 }
0x10a7   :  { %v1396_v17 = vpop.eup %1395 }
0x10a8   :  { %v589_v18 = vadd.f32 1.0, %v1396_v17 }
0x10aa   :  { %1397 = vrcp.f32 %v589_v18  ;;  %v601_v26 = vand.u32 2147483648, %v589_v18  ;;  %vm595_vm6 = vweird.f32 %v589_v18  ;;  %v599_v27 = vand.u32 2147483647, %v589_v18 }
0x10ab   :  { %v690_v44 = vpop.f32.mrf.mxu1 }
0x10ac   :  { %v602_v28 = vor.u32 1.1754944e-38, %v601_v26  ;;  %vm600_vm8 = vcmp.eq.f32.partialorder %v599_v27, 8.507059e+37  ;;  %v1826_v45 = vadd.f32 %v1670_v22, %v690_v44 }
0x10b0   :  { %v1398_v19 = vpop.eup %1397 }
0x10b1   :  { %v591_v20 = vmul.f32 %v1398_v19, %v589_v18  ;;  %vm596_vm5 = vweird.f32 %v1398_v19 }
0x10b2   :  { %vm597_vm7 = vmor %vm595_vm6, %vm596_vm5 }
0x10b3   :  { %v592_v25 = vsub.f32 1.0, %v591_v20 }
0x10b5   :  { %v593_v48 = vmul.f32 %v1398_v19, %v592_v25 }
0x10b7   :  { %v594_v24 = vadd.f32 %v1398_v19, %v593_v48 }
0x10b9   :  { %v598_v38 = vsel %vm597_vm7, %v1398_v19, %v594_v24 }
0x10ba   :  { %v603_v30 = vsel %vm600_vm8, %v602_v28, %v598_v38 }
0x10bb   :  { %v609_v33 = vmul.f32 %v607_v32, %v603_v30 }
0x1118   :  { %v612_v29 = vpop.permute.xlu1 %611 }
0x1119   :  { %v614_v31 = vmul.f32 %v612_v29, %v603_v30 }
0x111b   :  { %616 = vrot.lane.b32.xlu0 %v614_v31, %s1470_s21 }
0x118d   :  { %v617_v35 = vpop.permute.xlu0 %616 }
0x118e   :  { %v619_v36 = vadd.f32 %v617_v35, %v609_v33 }
0x1190   :  { %1399 = vtanh.f32 %v619_v36  ;;  %v744_v21 = vrot.slane %v619_v36, 6 }
0x1196   :  { %v1400_v37 = vpop.eup %1399 }
0x1197   :  { %622 = vrot.lane.b32.xlu1 %v1400_v37, %s1470_s21 }
0x1209   :  { %v623_v39 = vpop.permute.xlu1 %622 }
0x120a   :  { %v625_v40 = vmul.f32 %v623_v39, %v603_v30 }
0x120c   :  { %v697_v41 = vrot.slane %v625_v40, 6  ;;  %v634_v42 = vsel %vm630_vm3, %v633_v2, %v625_v40 }
0x120e   :  { %698 = vrot.lane.b32.xlu2 %v697_v41, %s1471_s22 }
0x1268   :  { %v699_v43 = vpop.permute.xlu2 %698 }
0x1269   :  { %1314 = vmatmul.msk.f32.vlgmr.msrb.gmra.mxu2 %vm79_vm4, %v699_v43 }
0x126a   :  { %990 = vmatpush.msrb.mxu2 %v1537_v4 }
0x126c   :  { %991 = vmatpush.msrb.mxu2 %v1544_v5 }
0x126e   :  { %992 = vmatpush.msrb.mxu2 %v1554_v7 }
0x1270   :  { %993 = vmatpush.msrb.mxu2 %v1568_v9 }
0x12ec   :  { %v719_v46 = vpop.f32.mrf.mxu2 }
0x12ed   :  { %v722_v47 = vadd.f32 %v719_v46, %v1826_v45 }
0x12ef   :  { %1401 = vtanh.f32 %v722_v47  ;;  %v1315_v50 = vmul.f32 -1.442695, %v722_v47 }
0x12f1   :  { %1403 = vpow2.f32 %v1315_v50 }
0x12f5   :  { %v1402_v49 = vpop.eup %1401 }
0x12f6   :  { %748 = vrot.lane.b32.xlu0 %v1402_v49, %s1470_s21 }
0x12f7   :  { %v1404_v4 = vpop.eup %1403 }
0x12f8   :  { %v726_v51 = vadd.f32 1.0, %v1404_v4 }
0x12fa   :  { %1405 = vrcp.f32 %v726_v51  ;;  %v738_v22 = vand.u32 2147483648, %v726_v51  ;;  %vm732_vm10 = vweird.f32 %v726_v51  ;;  %v736_v55 = vand.u32 2147483647, %v726_v51 }
0x12fc   :  { %v739_v57 = vor.u32 1.1754944e-38, %v738_v22  ;;  %vm737_vm12 = vcmp.eq.f32.partialorder %v736_v55, 8.507059e+37 }
0x1300   :  { %v1406_v5 = vpop.eup %1405 }
0x1301   :  { %v728_v7 = vmul.f32 %v1406_v5, %v726_v51  ;;  %vm733_vm9 = vweird.f32 %v1406_v5 }
0x1302   :  { %vm734_vm11 = vmor %vm732_vm10, %vm733_vm9 }
0x1303   :  { %v729_v52 = vsub.f32 1.0, %v728_v7 }
0x1305   :  { %v730_v53 = vmul.f32 %v1406_v5, %v729_v52 }
0x1307   :  { %v731_v54 = vadd.f32 %v1406_v5, %v730_v53 }
0x1309   :  { %v735_v56 = vsel %vm734_vm11, %v1406_v5, %v731_v54 }
0x130a   :  { %v740_v59 = vsel %vm737_vm12, %v739_v57, %v735_v56 }
0x130b   :  { %v746_v23 = vmul.f32 %v744_v21, %v740_v59 }
0x1368   :  { %v749_v58 = vpop.permute.xlu0 %748 }
0x1369   :  { %v751_v60 = vmul.f32 %v749_v58, %v740_v59 }
0x136b   :  { %753 = vrot.lane.b32.xlu1 %v751_v60, %s1470_s21 }
0x13dd   :  { %v754_v0 = vpop.permute.xlu1 %753 }
0x13de   :  { %v756_v1 = vadd.f32 %v754_v0, %v746_v23 }
0x13e0   :  { %1407 = vtanh.f32 %v756_v1  ;;  %v813_v35 = vrot.slane %v756_v1, 6 }
0x13e6   :  { %v1408_v2 = vpop.eup %1407 }
0x13e7   :  { %759 = vrot.lane.b32.xlu2 %v1408_v2, %s1470_s21 }
0x1441   :  { %v760_v3 = vpop.permute.xlu2 %759 }
0x1442   :  { %v1832_v6 = vmul.f32 %v760_v3, %v740_v59 }
0x1444   :  { %764 = vrot.lane.b32.xlu0 %v1832_v6, %s1471_s22 }
0x14b6   :  { %v765_v8 = vpop.permute.xlu0 %764 }
0x14b7   :  { %1316 = vmatmul.msk.f32.vlgmr.msra.gmra.mxu2 %vm79_vm4, %v765_v8 }
0x14b8   :  { %1196 = vmatpush.msra.mxu2 %v1465_v10 }
0x14ba   :  { %1197 = vmatpush.msra.mxu2 %v1466_v11 }
0x14bc   :  { %1198 = vmatpush.msra.mxu2 %v1467_v13 }
0x14be   :  { %1199 = vmatpush.msra.mxu2 %v1568_v9 }
0x153a   :  { %v785_v14 = vpop.f32.mrf.mxu2 }
0x153b   :  { %v789_v15 = vrot.slane %v785_v14, 6 }
0x153d   :  { %v791_v16 = vadd.f32 %v789_v15, %v1826_v45 }
0x153f   :  { %1409 = vtanh.f32 %v791_v16  ;;  %v1317_v18 = vmul.f32 -1.442695, %v791_v16 }
0x1541   :  { %1411 = vpow2.f32 %v1317_v18 }
0x1545   :  { %v1410_v17 = vpop.eup %1409 }
0x1546   :  { %817 = vrot.lane.b32.xlu1 %v1410_v17, %s1470_s21 }
0x1547   :  { %v1412_v19 = vpop.eup %1411 }
0x1548   :  { %v795_v20 = vadd.f32 1.0, %v1412_v19 }
0x154a   :  { %1413 = vrcp.f32 %v795_v20  ;;  %v807_v27 = vand.u32 2147483648, %v795_v20  ;;  %vm801_vm0 = vweird.f32 %v795_v20  ;;  %v805_v38 = vand.u32 2147483647, %v795_v20 }
0x154c   :  { %v808_v29 = vor.u32 1.1754944e-38, %v807_v27  ;;  %vm806_vm2 = vcmp.eq.f32.partialorder %v805_v38, 8.507059e+37 }
0x154e   :  { %642 = vrot.lane.b32.xlu1 %v634_v42, %s1471_s22 }
0x1550   :  { %v1414_v25 = vpop.eup %1413 }
0x1551   :  { %v797_v48 = vmul.f32 %v1414_v25, %v795_v20  ;;  %vm802_vm15 = vweird.f32 %v1414_v25 }
0x1552   :  { %vm803_vm1 = vmor %vm801_vm0, %vm802_vm15 }
0x1553   :  { %v798_v24 = vsub.f32 1.0, %v797_v48 }
0x1555   :  { %v799_v26 = vmul.f32 %v1414_v25, %v798_v24 }
0x1557   :  { %v800_v9 = vadd.f32 %v1414_v25, %v799_v26 }
0x1559   :  { %v804_v28 = vsel %vm803_vm1, %v1414_v25, %v800_v9 }
0x155a   :  { %v809_v31 = vsel %vm806_vm2, %v808_v29, %v804_v28 }
0x155b   :  { %v815_v36 = vmul.f32 %v813_v35, %v809_v31 }
0x15b8   :  { %v818_v30 = vpop.permute.xlu1 %817 }
0x15b9   :  { %v820_v32 = vmul.f32 %v818_v30, %v809_v31 }
0x15bb   :  { %822 = vrot.lane.b32.xlu2 %v820_v32, %s1470_s21 }
0x15c0   :  { %v643_v33 = vpop.permute.xlu1 %642 }
0x15c1   :  { %1313 = vmatmul.msk.f32.gmra.mxu3 %vm79_vm4, %v643_v33 }
0x1615   :  { %v823_v37 = vpop.permute.xlu2 %822 }
0x1616   :  { %v825_v39 = vadd.f32 %v823_v37, %v815_v36 }
0x1618   :  { %1415 = vtanh.f32 %v825_v39  ;;  %v883_v60 = vrot.slane %v825_v39, 6 }
0x161e   :  { %v1416_v40 = vpop.eup %1415 }
0x161f   :  { %828 = vrot.lane.b32.xlu0 %v1416_v40, %s1470_s21 }
0x1644   :  { %v668_v41 = vpop.f32.mrf.mxu3 }
0x1645   :  { %v669_v42 = vadd.f32 %v1807_v12, %v668_v41 }
0x1647   :  { %672 = vst [vmem:[%s1934_s6 + $0x8] sm:$0xff] %v669_v42  ;;  %692 = vmatmul.f32.gmra.mxu1 %v669_v42 }
0x1691   :  { %v829_v43 = vpop.permute.xlu0 %828 }
0x1692   :  { %v831_v44 = vmul.f32 %v829_v43, %v809_v31 }
0x1694   :  { %v833_v46 = vrot.slane %v831_v44, 2  ;;  %v1248_v8 = vsel %vm626_vm13, %v1832_v6, %v831_v44  ;;  %v1468_v44 = vld [vmem:[%s1930_s3] ss:$0 sm:$0xff] }
0x1696   :  { %834 = vrot.lane.b32.xlu2 %v833_v46, %s1471_s22 }
0x16c4   :  { %v693_v43 = vpop.f32.mrf.mxu1 }
0x16c5   :  { %v1884_v46 = vadd.f32 %v1468_v44, %v693_v43 }
0x16f0   :  { %v835_v47 = vpop.permute.xlu2 %834 }
0x16f1   :  { %1318 = vmatmul.msk.f32.vlgmr.msrb.gmra.mxu3 %vm79_vm4, %v835_v47 }
0x16f2   :  { %1276 = vmatpush.msrb.mxu3 %v1765_v61 }
0x16f4   :  { %1277 = vmatpush.msrb.mxu3 %v1771_v62 }
0x16f6   :  { %1278 = vmatpush.msrb.mxu3 %v1777_v63 }
0x16f8   :  { %1279 = vmatpush.msrb.mxu3 %v1782_v34 }
0x1774   :  { %v855_v49 = vpop.f32.mrf.mxu3 }
0x1775   :  { %v859_v50 = vrot.slane %v855_v49, 4 }
0x1777   :  { %v861_v4 = vadd.f32 %v859_v50, %v1826_v45 }
0x1779   :  { %1417 = vtanh.f32 %v861_v4  ;;  %v1319_v5 = vmul.f32 -1.442695, %v861_v4 }
0x177b   :  { %1419 = vpow2.f32 %v1319_v5 }
0x177f   :  { %v1418_v51 = vpop.eup %1417 }
0x1780   :  { %887 = vrot.lane.b32.xlu0 %v1418_v51, %s1470_s21 }
0x1781   :  { %v1420_v7 = vpop.eup %1419 }
0x1782   :  { %v865_v52 = vadd.f32 1.0, %v1420_v7 }
0x1784   :  { %1421 = vrcp.f32 %v865_v52  ;;  %v877_v34 = vand.u32 2147483648, %v865_v52  ;;  %vm871_vm6 = vweird.f32 %v865_v52  ;;  %v875_v22 = vand.u32 2147483647, %v865_v52 }
0x1786   :  { %v878_v56 = vor.u32 1.1754944e-38, %v877_v34  ;;  %vm876_vm8 = vcmp.eq.f32.partialorder %v875_v22, 8.507059e+37 }
0x178a   :  { %v1422_v61 = vpop.eup %1421 }
0x178b   :  { %v867_v53 = vmul.f32 %v1422_v61, %v865_v52  ;;  %vm872_vm5 = vweird.f32 %v1422_v61 }
0x178c   :  { %vm873_vm7 = vmor %vm871_vm6, %vm872_vm5 }
0x178d   :  { %v868_v62 = vsub.f32 1.0, %v867_v53 }
0x178f   :  { %v869_v54 = vmul.f32 %v1422_v61, %v868_v62 }
0x1791   :  { %v870_v63 = vadd.f32 %v1422_v61, %v869_v54 }
0x1793   :  { %v874_v55 = vsel %vm873_vm7, %v1422_v61, %v870_v63 }
0x1794   :  { %v879_v58 = vsel %vm876_vm8, %v878_v56, %v874_v55 }
0x1795   :  { %v885_v21 = vmul.f32 %v883_v60, %v879_v58 }
0x17f2   :  { %v888_v57 = vpop.permute.xlu0 %887 }
0x17f3   :  { %v890_v59 = vmul.f32 %v888_v57, %v879_v58 }
0x17f5   :  { %892 = vrot.lane.b32.xlu1 %v890_v59, %s1470_s21 }
0x1867   :  { %v893_v23 = vpop.permute.xlu1 %892 }
0x1868   :  { %v895_v0 = vadd.f32 %v893_v23, %v885_v21 }
0x186a   :  { %1423 = vtanh.f32 %v895_v0  ;;  %v953_v31 = vrot.slane %v895_v0, 6 }
0x1870   :  { %v1424_v1 = vpop.eup %1423 }
0x1871   :  { %898 = vrot.lane.b32.xlu2 %v1424_v1, %s1470_s21 }
0x18cb   :  { %v899_v2 = vpop.permute.xlu2 %898 }
0x18cc   :  { %v901_v3 = vmul.f32 %v899_v2, %v879_v58 }
0x18ce   :  { %v903_v10 = vrot.slane %v901_v3, 4  ;;  %v1249_v11 = vsel %vm628_vm14, %v1248_v8, %v901_v3 }
0x18d0   :  { %904 = vrot.lane.b32.xlu0 %v903_v10, %s1471_s22 }
0x1942   :  { %v905_v13 = vpop.permute.xlu0 %904 }
0x1943   :  { %1320 = vmatmul.msk.f32.vlgmr.msrb.gmra.mxu0 %vm79_vm4, %v905_v13 }
0x19c0   :  { %v925_v14 = vpop.f32.mrf.mxu0 }
0x19c1   :  { %v929_v15 = vrot.slane %v925_v14, 2 }
0x19c3   :  { %v931_v16 = vadd.f32 %v929_v15, %v1826_v45 }
0x19c5   :  { %1425 = vtanh.f32 %v931_v16  ;;  %v1321_v18 = vmul.f32 -1.442695, %v931_v16 }
0x19c7   :  { %1427 = vpow2.f32 %v1321_v18 }
0x19cb   :  { %v1426_v17 = vpop.eup %1425 }
0x19cc   :  { %957 = vrot.lane.b32.xlu1 %v1426_v17, %s1470_s21 }
0x19cd   :  { %v1428_v19 = vpop.eup %1427 }
0x19ce   :  { %v935_v6 = vadd.f32 1.0, %v1428_v19 }
0x19d0   :  { %1429 = vrcp.f32 %v935_v6  ;;  %v947_v9 = vand.u32 2147483648, %v935_v6  ;;  %vm941_vm10 = vweird.f32 %v935_v6  ;;  %v945_v27 = vand.u32 2147483647, %v935_v6 }
0x19d2   :  { %v948_v38 = vor.u32 1.1754944e-38, %v947_v9  ;;  %vm946_vm12 = vcmp.eq.f32.partialorder %v945_v27, 8.507059e+37 }
0x19d6   :  { %v1430_v20 = vpop.eup %1429 }
0x19d7   :  { %v937_v25 = vmul.f32 %v1430_v20, %v935_v6  ;;  %vm942_vm9 = vweird.f32 %v1430_v20 }
0x19d8   :  { %vm943_vm11 = vmor %vm941_vm10, %vm942_vm9 }
0x19d9   :  { %v938_v48 = vsub.f32 1.0, %v937_v25 }
0x19db   :  { %v939_v24 = vmul.f32 %v1430_v20, %v938_v48 }
0x19dd   :  { %v940_v26 = vadd.f32 %v1430_v20, %v939_v24 }
0x19df   :  { %v944_v45 = vsel %vm943_vm11, %v1430_v20, %v940_v26 }
0x19e0   :  { %v949_v29 = vsel %vm946_vm12, %v948_v38, %v944_v45 }
0x19e1   :  { %v955_v32 = vmul.f32 %v953_v31, %v949_v29 }
0x1a3e   :  { %v958_v28 = vpop.permute.xlu1 %957 }
0x1a3f   :  { %v960_v30 = vmul.f32 %v958_v28, %v949_v29 }
0x1a41   :  { %962 = vrot.lane.b32.xlu2 %v960_v30, %s1470_s21 }
0x1a9b   :  { %v963_v33 = vpop.permute.xlu2 %962 }
0x1a9c   :  { %v965_v35 = vadd.f32 %v963_v33, %v955_v32 }
0x1a9e   :  { %1431 = vtanh.f32 %v965_v35  ;;  %v1020_v58 = vrot.slane %v965_v35, 6 }
0x1aa4   :  { %v1432_v36 = vpop.eup %1431 }
0x1aa5   :  { %968 = vrot.lane.b32.xlu0 %v1432_v36, %s1470_s21 }
0x1b17   :  { %v969_v37 = vpop.permute.xlu0 %968 }
0x1b18   :  { %v971_v39 = vmul.f32 %v969_v37, %v949_v29 }
0x1b1a   :  { %v973_v40 = vrot.slane %v971_v39, 6  ;;  %v1877_v41 = vsel %vm630_vm3, %v1249_v11, %v971_v39 }
0x1b1c   :  { %974 = vrot.lane.b32.xlu1 %v973_v40, %s1471_s22 }
0x1b8e   :  { %v975_v42 = vpop.permute.xlu1 %974 }
0x1b8f   :  { %1322 = vmatmul.msk.f32.vlgmr.msrb.gmra.mxu2 %vm79_vm4, %v975_v42 }
0x1c12   :  { %v995_v47 = vpop.f32.mrf.mxu2 }
0x1c13   :  { %v998_v49 = vadd.f32 %v995_v47, %v1884_v46 }
0x1c15   :  { %1433 = vtanh.f32 %v998_v49  ;;  %v1323_v4 = vmul.f32 -1.442695, %v998_v49 }
0x1c17   :  { %1435 = vpow2.f32 %v1323_v4 }
0x1c1b   :  { %v1434_v50 = vpop.eup %1433 }
0x1c1c   :  { %1024 = vrot.lane.b32.xlu2 %v1434_v50, %s1470_s21 }
0x1c1d   :  { %v1436_v51 = vpop.eup %1435 }
0x1c1e   :  { %v1002_v5 = vadd.f32 1.0, %v1436_v51 }
0x1c20   :  { %1437 = vrcp.f32 %v1002_v5  ;;  %v1014_v54 = vand.u32 2147483648, %v1002_v5  ;;  %vm1008_vm0 = vweird.f32 %v1002_v5  ;;  %v1012_v63 = vand.u32 2147483647, %v1002_v5 }
0x1c22   :  { %v1015_v22 = vor.u32 1.1754944e-38, %v1014_v54  ;;  %vm1013_vm2 = vcmp.eq.f32.partialorder %v1012_v63, 8.507059e+37 }
0x1c26   :  { %v1438_v7 = vpop.eup %1437 }
0x1c27   :  { %v1004_v52 = vmul.f32 %v1438_v7, %v1002_v5  ;;  %vm1009_vm15 = vweird.f32 %v1438_v7 }
0x1c28   :  { %vm1010_vm1 = vmor %vm1008_vm0, %vm1009_vm15 }
0x1c29   :  { %v1005_v61 = vsub.f32 1.0, %v1004_v52 }
0x1c2b   :  { %v1006_v53 = vmul.f32 %v1438_v7, %v1005_v61 }
0x1c2d   :  { %v1007_v62 = vadd.f32 %v1438_v7, %v1006_v53 }
0x1c2f   :  { %v1011_v34 = vsel %vm1010_vm1, %v1438_v7, %v1007_v62 }
0x1c30   :  { %v1016_v56 = vsel %vm1013_vm2, %v1015_v22, %v1011_v34 }
0x1c31   :  { %v1022_v59 = vmul.f32 %v1020_v58, %v1016_v56 }
0x1c76   :  { %v1025_v55 = vpop.permute.xlu2 %1024 }
0x1c77   :  { %v1027_v57 = vmul.f32 %v1025_v55, %v1016_v56 }
0x1c79   :  { %1029 = vrot.lane.b32.xlu0 %v1027_v57, %s1470_s21 }
0x1ceb   :  { %v1030_v60 = vpop.permute.xlu0 %1029 }
0x1cec   :  { %v1032_v21 = vadd.f32 %v1030_v60, %v1022_v59 }
0x1cee   :  { %1439 = vtanh.f32 %v1032_v21  ;;  %v1089_v45 = vrot.slane %v1032_v21, 6 }
0x1cf4   :  { %v1440_v23 = vpop.eup %1439 }
0x1cf5   :  { %1035 = vrot.lane.b32.xlu1 %v1440_v23, %s1470_s21 }
0x1d67   :  { %v1036_v0 = vpop.permute.xlu1 %1035 }
0x1d68   :  { %v1890_v1 = vmul.f32 %v1036_v0, %v1016_v56 }
0x1d6a   :  { %1040 = vrot.lane.b32.xlu2 %v1890_v1, %s1471_s22 }
0x1dc4   :  { %v1041_v2 = vpop.permute.xlu2 %1040 }
0x1dc5   :  { %1324 = vmatmul.msk.f32.vlgmr.msra.gmra.mxu3 %vm79_vm4, %v1041_v2 }
0x1e48   :  { %v1061_v3 = vpop.f32.mrf.mxu3 }
0x1e49   :  { %v1065_v8 = vrot.slane %v1061_v3, 6 }
0x1e4b   :  { %v1067_v10 = vadd.f32 %v1065_v8, %v1884_v46 }
0x1e4d   :  { %1441 = vtanh.f32 %v1067_v10  ;;  %v1325_v13 = vmul.f32 -1.442695, %v1067_v10 }
0x1e4f   :  { %1443 = vpow2.f32 %v1325_v13 }
0x1e53   :  { %v1442_v11 = vpop.eup %1441 }
0x1e54   :  { %1093 = vrot.lane.b32.xlu0 %v1442_v11, %s1470_s21 }
0x1e55   :  { %v1444_v14 = vpop.eup %1443 }
0x1e56   :  { %v1071_v15 = vadd.f32 1.0, %v1444_v14 }
0x1e58   :  { %1445 = vrcp.f32 %v1071_v15  ;;  %v1083_v20 = vand.u32 2147483648, %v1071_v15  ;;  %vm1077_vm6 = vweird.f32 %v1071_v15  ;;  %v1081_v25 = vand.u32 2147483647, %v1071_v15 }
0x1e5a   :  { %v1084_v24 = vor.u32 1.1754944e-38, %v1083_v20  ;;  %vm1082_vm8 = vcmp.eq.f32.partialorder %v1081_v25, 8.507059e+37 }
0x1e5e   :  { %v1446_v16 = vpop.eup %1445 }
0x1e5f   :  { %v1073_v17 = vmul.f32 %v1446_v16, %v1071_v15  ;;  %vm1078_vm5 = vweird.f32 %v1446_v16 }
0x1e60   :  { %vm1079_vm7 = vmor %vm1077_vm6, %vm1078_vm5 }
0x1e61   :  { %v1074_v18 = vsub.f32 1.0, %v1073_v17 }
0x1e63   :  { %v1075_v19 = vmul.f32 %v1446_v16, %v1074_v18 }
0x1e65   :  { %v1076_v6 = vadd.f32 %v1446_v16, %v1075_v19 }
0x1e67   :  { %v1080_v48 = vsel %vm1079_vm7, %v1446_v16, %v1076_v6 }
0x1e68   :  { %v1085_v9 = vsel %vm1082_vm8, %v1084_v24, %v1080_v48 }
0x1e69   :  { %v1091_v38 = vmul.f32 %v1089_v45, %v1085_v9 }
0x1ec6   :  { %v1094_v26 = vpop.permute.xlu0 %1093 }
0x1ec7   :  { %v1096_v27 = vmul.f32 %v1094_v26, %v1085_v9 }
0x1ec9   :  { %1098 = vrot.lane.b32.xlu1 %v1096_v27, %s1470_s21 }
0x1f3b   :  { %v1099_v28 = vpop.permute.xlu1 %1098 }
0x1f3c   :  { %v1101_v29 = vadd.f32 %v1099_v28, %v1091_v38 }
0x1f3e   :  { %1447 = vtanh.f32 %v1101_v29  ;;  %v1159_v63 = vrot.slane %v1101_v29, 6 }
0x1f44   :  { %v1448_v30 = vpop.eup %1447 }
0x1f45   :  { %1104 = vrot.lane.b32.xlu2 %v1448_v30, %s1470_s21 }
0x1f9f   :  { %v1105_v31 = vpop.permute.xlu2 %1104 }
0x1fa0   :  { %v1107_v32 = vmul.f32 %v1105_v31, %v1085_v9 }
0x1fa2   :  { %v1109_v33 = vrot.slane %v1107_v32, 2  ;;  %v1251_v59 = vsel %vm626_vm13, %v1890_v1, %v1107_v32 }
0x1fa4   :  { %1110 = vrot.lane.b32.xlu0 %v1109_v33, %s1471_s22 }
0x2016   :  { %v1111_v35 = vpop.permute.xlu0 %1110 }
0x2017   :  { %1326 = vmatmul.msk.f32.vlgmr.msra.gmra.mxu0 %vm79_vm4, %v1111_v35 }
0x2094   :  { %v1131_v36 = vpop.f32.mrf.mxu0 }
0x2095   :  { %v1135_v37 = vrot.slane %v1131_v36, 4 }
0x2097   :  { %v1137_v39 = vadd.f32 %v1135_v37, %v1884_v46 }
0x2099   :  { %1449 = vtanh.f32 %v1137_v39  ;;  %v1327_v42 = vmul.f32 -1.442695, %v1137_v39 }
0x209b   :  { %1451 = vpow2.f32 %v1327_v42 }
0x209f   :  { %v1450_v40 = vpop.eup %1449 }
0x20a0   :  { %1163 = vrot.lane.b32.xlu1 %v1450_v40, %s1470_s21 }
0x20a1   :  { %v1452_v43 = vpop.eup %1451 }
0x20a2   :  { %v1141_v44 = vadd.f32 1.0, %v1452_v43 }
0x20a4   :  { %1453 = vrcp.f32 %v1141_v44  ;;  %v1153_v5 = vand.u32 2147483648, %v1141_v44  ;;  %vm1147_vm10 = vweird.f32 %v1141_v44  ;;  %v1151_v7 = vand.u32 2147483647, %v1141_v44 }
0x20a6   :  { %v1154_v61 = vor.u32 1.1754944e-38, %v1153_v5  ;;  %vm1152_vm12 = vcmp.eq.f32.partialorder %v1151_v7, 8.507059e+37 }
0x20aa   :  { %v1454_v47 = vpop.eup %1453 }
0x20ab   :  { %v1143_v49 = vmul.f32 %v1454_v47, %v1141_v44  ;;  %vm1148_vm9 = vweird.f32 %v1454_v47 }
0x20ac   :  { %vm1149_vm11 = vmor %vm1147_vm10, %vm1148_vm9 }
0x20ad   :  { %v1144_v50 = vsub.f32 1.0, %v1143_v49 }
0x20af   :  { %v1145_v4 = vmul.f32 %v1454_v47, %v1144_v50 }
0x20b1   :  { %v1146_v51 = vadd.f32 %v1454_v47, %v1145_v4 }
0x20b3   :  { %v1150_v52 = vsel %vm1149_vm11, %v1454_v47, %v1146_v51 }
0x20b4   :  { %v1155_v62 = vsel %vm1152_vm12, %v1154_v61, %v1150_v52 }
0x20b5   :  { %v1161_v34 = vmul.f32 %v1159_v63, %v1155_v62 }
0x2112   :  { %v1164_v53 = vpop.permute.xlu1 %1163 }
0x2113   :  { %v1166_v54 = vmul.f32 %v1164_v53, %v1155_v62 }
0x2115   :  { %1168 = vrot.lane.b32.xlu2 %v1166_v54, %s1470_s21 }
0x216f   :  { %v1169_v22 = vpop.permute.xlu2 %1168 }
0x2170   :  { %v1171_v55 = vadd.f32 %v1169_v22, %v1161_v34 }
0x2172   :  { %1455 = vtanh.f32 %v1171_v55  ;;  %v1229_v24 = vrot.slane %v1171_v55, 6 }
0x2178   :  { %v1456_v56 = vpop.eup %1455 }
0x2179   :  { %1174 = vrot.lane.b32.xlu0 %v1456_v56, %s1470_s21 }
0x21eb   :  { %v1175_v57 = vpop.permute.xlu0 %1174 }
0x21ec   :  { %v1177_v58 = vmul.f32 %v1175_v57, %v1155_v62 }
0x21ee   :  { %v1179_v60 = vrot.slane %v1177_v58, 4  ;;  %v1252_v21 = vsel %vm628_vm14, %v1251_v59, %v1177_v58 }
0x21f0   :  { %1180 = vrot.lane.b32.xlu1 %v1179_v60, %s1471_s22 }
0x2262   :  { %v1181_v23 = vpop.permute.xlu1 %1180 }
0x2263   :  { %1328 = vmatmul.msk.f32.vlgmr.msra.gmra.mxu2 %vm79_vm4, %v1181_v23 }
0x22e6   :  { %v1201_v0 = vpop.f32.mrf.mxu2 }
0x22e7   :  { %v1205_v2 = vrot.slane %v1201_v0, 2 }
0x22e9   :  { %v1207_v3 = vadd.f32 %v1205_v2, %v1884_v46 }
0x22eb   :  { %1457 = vtanh.f32 %v1207_v3  ;;  %v1329_v1 = vmul.f32 -1.442695, %v1207_v3 }
0x22ed   :  { %1459 = vpow2.f32 %v1329_v1 }
0x22f1   :  { %v1458_v8 = vpop.eup %1457 }
0x22f2   :  { %1233 = vrot.lane.b32.xlu2 %v1458_v8, %s1470_s21 }
0x22f3   :  { %v1460_v10 = vpop.eup %1459 }
0x22f4   :  { %v1211_v11 = vadd.f32 1.0, %v1460_v10 }
0x22f6   :  { %1461 = vrcp.f32 %v1211_v11  ;;  %v1223_v18 = vand.u32 2147483648, %v1211_v11  ;;  %vm1217_vm14 = vweird.f32 %v1211_v11  ;;  %v1221_v46 = vand.u32 2147483647, %v1211_v11 }
0x22f8   :  { %v1224_v6 = vor.u32 1.1754944e-38, %v1223_v18  ;;  %vm1222_vm0 = vcmp.eq.f32.partialorder %v1221_v46, 8.507059e+37 }
0x22fa   :  { %1256 = vrot.lane.b32.xlu2 %v1877_v41, %s1471_s22 }
0x22fc   :  { %v1462_v13 = vpop.eup %1461 }
0x22fd   :  { %v1213_v14 = vmul.f32 %v1462_v13, %v1211_v11  ;;  %vm1218_vm13 = vweird.f32 %v1462_v13 }
0x22fe   :  { %vm1219_vm15 = vmor %vm1217_vm14, %vm1218_vm13 }
0x22ff   :  { %v1214_v15 = vsub.f32 1.0, %v1213_v14 }
0x2301   :  { %v1215_v16 = vmul.f32 %v1462_v13, %v1214_v15 }
0x2303   :  { %v1216_v17 = vadd.f32 %v1462_v13, %v1215_v16 }
0x2305   :  { %v1220_v19 = vsel %vm1219_vm15, %v1462_v13, %v1216_v17 }
0x2306   :  { %v1225_v41 = vsel %vm1222_vm0, %v1224_v6, %v1220_v19 }
0x2307   :  { %v1231_v26 = vmul.f32 %v1229_v24, %v1225_v41 }
0x234c   :  { %v1234_v20 = vpop.permute.xlu2 %1233 }
0x234d   :  { %v1236_v25 = vmul.f32 %v1234_v20, %v1225_v41 }
0x234f   :  { %1238 = vrot.lane.b32.xlu0 %v1236_v25, %s1470_s21 }
0x2354   :  { %v1257_v48 = vpop.permute.xlu2 %1256 }
0x2355   :  { %1330 = vmatmul.msk.f32.vlgmr.msrb.gmra.mxu3 %vm79_vm4, %v1257_v48 }
0x23c1   :  { %v1239_v9 = vpop.permute.xlu0 %1238 }
0x23c2   :  { %v1241_v27 = vadd.f32 %v1239_v9, %v1231_v26 }
0x23c4   :  { %1463 = vtanh.f32 %v1241_v27 }
0x23ca   :  { %v1464_v45 = vpop.eup %1463 }
0x23cb   :  { %1244 = vrot.lane.b32.xlu1 %v1464_v45, %s1470_s21 }
0x23d8   :  { %v1281_v38 = vpop.f32.mrf.mxu3 }
0x23d9   :  { %v1282_v28 = vadd.f32 %v1807_v12, %v1281_v38 }
0x23db   :  { %1287 = vst [vmem:[%s1935_s7] sm:$0xff] %v1282_v28 }
0x243d   :  { %v1245_v29 = vpop.permute.xlu1 %1244 }
0x243e   :  { %v1247_v30 = vmul.f32 %v1245_v29, %v1225_v41 }
0x2440   :  { %v1253_v31 = vsel %vm630_vm3, %v1252_v21, %v1247_v30 }
0x2441   :  { %1258 = vrot.lane.b32.xlu0 %v1253_v31, %s1471_s22 }
0x24b3   :  { %v1259_v32 = vpop.permute.xlu0 %1258 }
0x24b4   :  { %1331 = vmatmul.msk.f32.gmra.mxu3 %vm79_vm4, %v1259_v32 }
0x2537   :  { %v1284_v33 = vpop.f32.mrf.mxu3 }
0x2538   :  { %v1285_v35 = vadd.f32 %v1807_v12, %v1284_v33 }
0x253a   :  { %1288 = vst [vmem:[%s1935_s7 + $0x8] sm:$0xff] %v1285_v35 }

</bundles_post_ra>
